<compile_context>
chip_gen: v7x
topology: tpu7x:2x2x1
jax: 0.10.0
libtpu: 0.0.40
codegen_flags: <defaults>
</compile_context>

<pallas_src>
import numpy as np
import jax
import jax.numpy as jnp
from jax import lax
from jax.experimental import pallas as pl
from jax.experimental.pallas import tpu as pltpu


# ----------------------------- small helpers -----------------------------

def _round_up(n, m):
    return ((n + m - 1) // m) * m


def _tile_rows(m, tm_max):
    # Tile size along M: multiple of 8, capped at tm_max, no bigger than needed.
    return min(tm_max, _round_up(m, 8))


def _pad2d(x, rows, cols):
    r, c = x.shape
    if (r, c) == (rows, cols):
        return x
    return jnp.pad(x, ((0, rows - r), (0, cols - c)))


_TILED_PARAMS = pltpu.CompilerParams(
    dimension_semantics=("parallel",),      # M-tile axis shards across TCs (v7x)
    vmem_limit_bytes=32 * 1024 * 1024,      # explicit scoped-VMEM budget, safe on v5e/v6e/v7x
)


# ----------------------------- Pallas kernels -----------------------------

def _conv_prelu_kernel(p_ref, w_ref, b_ref, a_ref, o_ref):
    # p: [TM, K] bf16, w: [K, C] bf16, b/a: [1, C] f32 -> o: [TM, C] f32
    y = jnp.dot(p_ref[...], w_ref[...], preferred_element_type=jnp.float32)
    y = y + b_ref[...]
    o_ref[...] = jnp.where(y >= 0.0, y, a_ref[...] * y)


def _conv3_heads_kernel(p_ref, w3_ref, b3_ref, a3_ref, wh_ref, bh_ref, o_ref):
    # Fused conv3 (3x3, 16->32) + PReLU + both 1x1 heads (32 -> 2+4, padded to 8).
    y = jnp.dot(p_ref[...], w3_ref[...], preferred_element_type=jnp.float32)
    y = y + b3_ref[...]
    y = jnp.where(y >= 0.0, y, a3_ref[...] * y)          # conv3 activation (VMEM resident)
    h = jnp.dot(y.astype(jnp.bfloat16), wh_ref[...],
                preferred_element_type=jnp.float32)
    o_ref[...] = h + bh_ref[...]


def _max4_kernel(a_ref, b_ref, c_ref, d_ref, o_ref):
    # elementwise max over the four corners of each 2x2 pooling window
    o_ref[...] = jnp.maximum(jnp.maximum(a_ref[...], b_ref[...]),
                             jnp.maximum(c_ref[...], d_ref[...]))


def _softmax_rows_kernel(x_ref, o_ref):
    # softmax over the last axis (rows are independent)
    x = x_ref[...]
    m = jnp.max(x, axis=-1, keepdims=True)
    e = jnp.exp(x - m)
    o_ref[...] = e / jnp.sum(e, axis=-1, keepdims=True)


# ----------------------------- Pallas callers -----------------------------

def _conv_prelu(patches, w2d, bias, alpha, *, tm_max=1024):
    """im2col conv + bias + PReLU, tiled over M.  Returns [M, COUT_padded] f32."""
    m, k = patches.shape
    cout = w2d.shape[1]
    kp = _round_up(k, 8)
    cp = _round_up(cout, 8)
    tm = _tile_rows(m, tm_max)
    mp = _round_up(m, tm)

    p = _pad2d(patches, mp, kp).astype(jnp.bfloat16)
    w = _pad2d(w2d, kp, cp).astype(jnp.bfloat16)
    b = _pad2d(bias.reshape(1, -1).astype(jnp.float32), 1, cp)
    a = _pad2d(alpha.reshape(1, -1).astype(jnp.float32), 1, cp)

    out = pl.pallas_call(
        _conv_prelu_kernel,
        out_shape=jax.ShapeDtypeStruct((mp, cp), jnp.float32),
        grid=(mp // tm,),
        in_specs=[
            pl.BlockSpec((tm, kp), lambda i: (i, 0)),   # streamed / double-buffered
            pl.BlockSpec((kp, cp), lambda i: (0, 0)),   # weights resident
            pl.BlockSpec((1, cp), lambda i: (0, 0)),
            pl.BlockSpec((1, cp), lambda i: (0, 0)),
        ],
        out_specs=pl.BlockSpec((tm, cp), lambda i: (i, 0)),
        compiler_params=_TILED_PARAMS,
    )(p, w, b, a)
    return out[:m]        # padded channels are exact zeros (zero weights / bias / alpha)


def _conv3_with_heads(patches, w3_2d, b3, a3, wh, bh, *, tm_max=1024):
    """Fused conv3 + PReLU + (conv4_1 | conv4_2) heads. Returns [M, 8] f32."""
    m, k = patches.shape
    c3 = w3_2d.shape[1]        # 32
    ch = wh.shape[1]           # 8 (2 cls + 4 reg + 2 pad)
    kp = _round_up(k, 8)
    tm = _tile_rows(m, tm_max)
    mp = _round_up(m, tm)

    p = _pad2d(patches, mp, kp).astype(jnp.bfloat16)
    w3 = _pad2d(w3_2d, kp, c3).astype(jnp.bfloat16)
    b3 = b3.reshape(1, c3).astype(jnp.float32)
    a3 = a3.reshape(1, c3).astype(jnp.float32)
    wh = wh.astype(jnp.bfloat16)
    bh = bh.reshape(1, ch).astype(jnp.float32)

    out = pl.pallas_call(
        _conv3_heads_kernel,
        out_shape=jax.ShapeDtypeStruct((mp, ch), jnp.float32),
        grid=(mp // tm,),
        in_specs=[
            pl.BlockSpec((tm, kp), lambda i: (i, 0)),
            pl.BlockSpec((kp, c3), lambda i: (0, 0)),
            pl.BlockSpec((1, c3), lambda i: (0, 0)),
            pl.BlockSpec((1, c3), lambda i: (0, 0)),
            pl.BlockSpec((c3, ch), lambda i: (0, 0)),
            pl.BlockSpec((1, ch), lambda i: (0, 0)),
        ],
        out_specs=pl.BlockSpec((tm, ch), lambda i: (i, 0)),
        compiler_params=_TILED_PARAMS,
    )(p, w3, b3, a3, wh, bh)
    return out[:m]


def _maxpool2x2_ceil(x_nhwc, *, tm_max=1024):
    # MaxPool2d(kernel=2, stride=2, ceil_mode=True), M-tiled 4-way max.
    n, h, w, c = x_nhwc.shape
    ph, pw = _round_up(h, 2), _round_up(w, 2)
    if (ph, pw) != (h, w):  # ceil_mode padding (not triggered for even dims)
        x_nhwc = jnp.pad(x_nhwc, ((0, 0), (0, ph - h), (0, pw - w), (0, 0)),
                         constant_values=-jnp.inf)
    oh, ow = ph // 2, pw // 2
    m = n * oh * ow
    tm = _tile_rows(m, tm_max)
    mp = _round_up(m, tm)
    corners = [_pad2d(x_nhwc[:, di::2, dj::2, :].reshape(m, c), mp, c)
               for di in (0, 1) for dj in (0, 1)]

    out = pl.pallas_call(
        _max4_kernel,
        out_shape=jax.ShapeDtypeStruct((mp, c), jnp.float32),
        grid=(mp // tm,),
        in_specs=[pl.BlockSpec((tm, c), lambda i: (i, 0))] * 4,
        out_specs=pl.BlockSpec((tm, c), lambda i: (i, 0)),
        compiler_params=_TILED_PARAMS,
    )(*corners)
    return out[:m].reshape(n, oh, ow, c)


def _softmax_last(x, *, tr_max=256):
    # softmax over the last axis (matches F.softmax(a, dim=-1) on NCHW logits)
    shp = x.shape
    w = shp[-1]
    rows = int(np.prod(shp[:-1]))
    x2 = x.reshape(rows, w).astype(jnp.float32)
    tr = _tile_rows(rows, tr_max)
    rp = _round_up(rows, tr)
    x2 = _pad2d(x2, rp, w)

    out = pl.pallas_call(
        _softmax_rows_kernel,
        out_shape=jax.ShapeDtypeStruct((rp, w), jnp.float32),
        grid=(rp // tr,),
        in_specs=[pl.BlockSpec((tr, w), lambda i: (i, 0))],
        out_specs=pl.BlockSpec((tr, w), lambda i: (i, 0)),
        compiler_params=_TILED_PARAMS,
    )(x2)
    return out[:rows].reshape(shp)


# ----------------------------- glue helpers -----------------------------

def _im2col(x_nhwc, kh, kw):
    n, h, w, c = x_nhwc.shape
    oh, ow = h - kh + 1, w - kw + 1
    cols = [x_nhwc[:, i:i + oh, j:j + ow, :] for i in range(kh) for j in range(kw)]
    p = jnp.concatenate(cols, axis=-1)                      # [n, oh, ow, kh*kw*c]
    return p.reshape(n * oh * ow, kh * kw * c), (n, oh, ow)


def _w2d(w_oihw, cin_pad=None):
    # PyTorch OIHW -> [KH*KW*CIN, COUT] matching the im2col feature order (i, j, c).
    # Optionally zero-pads the input-channel dim (to match channel-padded activations).
    o, c, kh, kw = w_oihw.shape
    w = jnp.transpose(w_oihw, (2, 3, 1, 0))                 # [kh, kw, cin, o]
    if cin_pad is not None and cin_pad > c:
        w = jnp.pad(w, ((0, 0), (0, 0), (0, cin_pad - c), (0, 0)))
        c = cin_pad
    return w.reshape(kh * kw * c, o)


# ----------------------------- parameters -----------------------------

def init_params(key):
    # Deterministic synthetic weights with the exact PyTorch parameter shapes.
    # (The original module loads pnet.npy; here we initialize in-script.)
    ks = jax.random.split(key, 13)

    def normal(k, shape, scale=0.1):
        return scale * jax.random.normal(k, shape, dtype=jnp.float32)

    def alpha(k, shape):
        return jax.random.uniform(k, shape, jnp.float32, 0.1, 0.4)

    return {
        'features.conv1.weight': normal(ks[0], (10, 3, 3, 3)),
        'features.conv1.bias':   normal(ks[1], (10,)),
        'features.prelu1.weight': alpha(ks[2], (10,)),
        'features.conv2.weight': normal(ks[3], (16, 10, 3, 3)),
        'features.conv2.bias':   normal(ks[4], (16,)),
        'features.prelu2.weight': alpha(ks[5], (16,)),
        'features.conv3.weight': normal(ks[6], (32, 16, 3, 3)),
        'features.conv3.bias':   normal(ks[7], (32,)),
        'features.prelu3.weight': alpha(ks[8], (32,)),
        'conv4_1.weight': normal(ks[9], (2, 32, 1, 1)),
        'conv4_1.bias':   normal(ks[10], (2,)),
        'conv4_2.weight': normal(ks[11], (4, 32, 1, 1)),
        'conv4_2.bias':   normal(ks[12], (4,)),
    }


# ----------------------------- forward pass -----------------------------

def pnet_forward(x_nchw, params):
    # NCHW -> NHWC; stream activations/patches in bf16 (f32 accumulation in-kernel).
    x = jnp.transpose(x_nchw, (0, 2, 3, 1)).astype(jnp.bfloat16)

    # conv1 (3->10, padded to 16) + PReLU
    p, (n, oh, ow) = _im2col(x, 3, 3)
    y = _conv_prelu(p, _w2d(params['features.conv1.weight']),
                    params['features.conv1.bias'],
                    params['features.prelu1.weight'])                  # [m, 16] f32
    y = y.reshape(n, oh, ow, y.shape[-1])

    # pool1: MaxPool2d(2, 2, ceil_mode=True)
    y = _maxpool2x2_ceil(y)

    # conv2 (10->16, input channels zero-padded 10->16) + PReLU
    p, (n, oh, ow) = _im2col(y.astype(jnp.bfloat16), 3, 3)
    y = _conv_prelu(p, _w2d(params['features.conv2.weight'], cin_pad=16),
                    params['features.conv2.bias'],
                    params['features.prelu2.weight'])                  # [m, 16] f32
    y = y.reshape(n, oh, ow, 16)

    # conv3 (16->32) + PReLU fused with conv4_1 (32->2) and conv4_2 (32->4) heads
    p, (n, oh, ow) = _im2col(y.astype(jnp.bfloat16), 3, 3)
    w41 = _w2d(params['conv4_1.weight'])                               # [32, 2]
    w42 = _w2d(params['conv4_2.weight'])                               # [32, 4]
    wh = jnp.concatenate([w41, w42, jnp.zeros((32, 2), jnp.float32)], axis=1)   # [32, 8]
    bh = jnp.concatenate([params['conv4_1.bias'], params['conv4_2.bias'],
                          jnp.zeros((2,), jnp.float32)])                        # [8]
    heads = _conv3_with_heads(p, _w2d(params['features.conv3.weight']),
                              params['features.conv3.bias'],
                              params['features.prelu3.weight'],
                              wh, bh)                                   # [m, 8] f32
    heads = heads.reshape(n, oh, ow, 8)

    a_logits = jnp.transpose(heads[..., 0:2], (0, 3, 1, 2))             # [B, 2, h', w']
    b_out = jnp.transpose(heads[..., 2:6], (0, 3, 1, 2))                # [B, 4, h', w']

    # F.softmax(a, dim=-1)  (over the WIDTH axis, exactly as in the PyTorch code)
    a_out = _softmax_last(a_logits)
    return b_out, a_out


# ----------------------------- pure-JAX reference -----------------------------

def pnet_reference(x, params):
    def conv(x, w, b):
        y = lax.conv_general_dilated(x, w, (1, 1), 'VALID',
                                     dimension_numbers=('NCHW', 'OIHW', 'NCHW'),
                                     precision=lax.Precision.HIGHEST)
        return y + b[None, :, None, None]

    def prelu(x, a):
        return jnp.where(x >= 0, x, a[None, :, None, None] * x)

    y = prelu(conv(x, params['features.conv1.weight'], params['features.conv1.bias']),
              params['features.prelu1.weight'])
    y = lax.reduce_window(y, -jnp.inf, lax.max, (1, 1, 2, 2), (1, 1, 2, 2), 'VALID')
    y = prelu(conv(y, params['features.conv2.weight'], params['features.conv2.bias']),
              params['features.prelu2.weight'])
    y = prelu(conv(y, params['features.conv3.weight'], params['features.conv3.bias']),
              params['features.prelu3.weight'])
    a = conv(y, params['conv4_1.weight'], params['conv4_1.bias'])
    b = conv(y, params['conv4_2.weight'], params['conv4_2.bias'])
    a = jax.nn.softmax(a, axis=-1)
    return b, a


if __name__ == "__main__":
    key = jax.random.PRNGKey(0)
    k_params, k_x = jax.random.split(key)
    params = init_params(k_params)

    # batch=2, 3 channels, 16x16 spatial -> output spatial 3x3
    x = jax.random.normal(k_x, (2, 3, 16, 16), dtype=jnp.float32)

    fwd = jax.jit(pnet_forward)
    b_out, a_out = jax.block_until_ready(fwd(x, params))
    assert b_out.shape == (2, 4, 3, 3), b_out.shape
    assert a_out.shape == (2, 2, 3, 3), a_out.shape

    b_ref, a_ref = jax.block_until_ready(pnet_reference(x, params))
    # bf16 MXU inputs (f32 accumulation) -> slightly looser tolerance than pure f32.
    np.testing.assert_allclose(np.asarray(b_out), np.asarray(b_ref), rtol=2e-2, atol=2e-2)
    np.testing.assert_allclose(np.asarray(a_out), np.asarray(a_ref), rtol=2e-2, atol=2e-2)

    print("KERNEL_OK")
</pallas_src>

<mosaic_0001>
module attributes {stable_mosaic.version = 11 : i64} {
  func.func @_conv_prelu_kernel(%arg0: i32, %arg1: memref<392x32xbf16, #tpu.memory_space<vmem>>, %arg2: memref<32x16xbf16, #tpu.memory_space<vmem>>, %arg3: memref<1x16xf32, #tpu.memory_space<vmem>>, %arg4: memref<1x16xf32, #tpu.memory_space<vmem>>, %arg5: memref<392x16xf32, #tpu.memory_space<vmem>>) attributes {dimension_semantics = [#tpu.dimension_semantics<parallel>], iteration_bounds = array<i64: 1>, scalar_prefetch = 0 : i64, scratch_operands = 0 : i64, tpu.core_type = #tpu.core_type<tc>, window_params = [{transform_indices = @transform_0, window_bounds = array<i64: 392, 32>}, {pipeline_mode = #tpu.pipeline_mode<synchronous>, transform_indices = @transform_1, window_bounds = array<i64: 32, 16>}, {pipeline_mode = #tpu.pipeline_mode<synchronous>, transform_indices = @transform_2, window_bounds = array<i64: 1, 16>}, {pipeline_mode = #tpu.pipeline_mode<synchronous>, transform_indices = @transform_3, window_bounds = array<i64: 1, 16>}, {transform_indices = @transform_4, window_bounds = array<i64: 392, 16>}]} {
    %c0 = arith.constant 0 : index
    %c0_0 = arith.constant 0 : index
    %0 = vector.load %arg1[%c0, %c0_0] : memref<392x32xbf16, #tpu.memory_space<vmem>>, vector<392x32xbf16>
    %c0_1 = arith.constant 0 : index
    %c0_2 = arith.constant 0 : index
    %1 = vector.load %arg2[%c0_1, %c0_2] : memref<32x16xbf16, #tpu.memory_space<vmem>>, vector<32x16xbf16>
    %cst = arith.constant dense<0.000000e+00> : vector<392x16xf32>
    %2 = tpu.matmul %0, %1, %cst {dimension_numbers = #tpu.dot_dimension_numbers<[1], [0], [0], [1], [0, 0, 1, 1], [], []>} : vector<392x32xbf16>, vector<32x16xbf16>, vector<392x16xf32> -> vector<392x16xf32>
    %c0_3 = arith.constant 0 : index
    %c0_4 = arith.constant 0 : index
    %3 = vector.load %arg3[%c0_3, %c0_4] : memref<1x16xf32, #tpu.memory_space<vmem>>, vector<1x16xf32>
    %4 = vector.broadcast %3 : vector<1x16xf32> to vector<392x16xf32>
    %5 = arith.addf %2, %4 : vector<392x16xf32>
    %cst_5 = arith.constant 0.000000e+00 : f32
    %6 = vector.broadcast %cst_5 : f32 to vector<392x16xf32>
    %7 = arith.cmpf oge, %5, %6 : vector<392x16xf32>
    %c0_6 = arith.constant 0 : index
    %c0_7 = arith.constant 0 : index
    %8 = vector.load %arg4[%c0_6, %c0_7] : memref<1x16xf32, #tpu.memory_space<vmem>>, vector<1x16xf32>
    %9 = vector.broadcast %8 : vector<1x16xf32> to vector<392x16xf32>
    %10 = arith.mulf %9, %5 : vector<392x16xf32>
    %11 = arith.select %7, %5, %10 : vector<392x16xi1>, vector<392x16xf32>
    %c0_8 = arith.constant 0 : index
    %c0_9 = arith.constant 0 : index
    %12 = vector.load %arg5[%c0_8, %c0_9] : memref<392x16xf32, #tpu.memory_space<vmem>>, vector<392x16xf32>
    tpu.vector_store %arg5[%c0_8, %c0_9], %11 {strides = array<i32>} : memref<392x16xf32, #tpu.memory_space<vmem>>, vector<392x16xf32>,
    return
  }
  func.func @transform_0(%arg0: i32) -> (i32, i32) {
    %c0_i32 = arith.constant 0 : i32
    %c0_i32_0 = arith.constant 0 : i32
    return %arg0, %c0_i32 : i32, i32
  }
  func.func @transform_1(%arg0: i32) -> (i32, i32) {
    %c0_i32 = arith.constant 0 : i32
    %c0_i32_0 = arith.constant 0 : i32
    %c0_i32_1 = arith.constant 0 : i32
    return %c0_i32, %c0_i32_0 : i32, i32
  }
  func.func @transform_2(%arg0: i32) -> (i32, i32) {
    %c0_i32 = arith.constant 0 : i32
    %c0_i32_0 = arith.constant 0 : i32
    %c0_i32_1 = arith.constant 0 : i32
    return %c0_i32, %c0_i32_0 : i32, i32
  }
  func.func @transform_3(%arg0: i32) -> (i32, i32) {
    %c0_i32 = arith.constant 0 : i32
    %c0_i32_0 = arith.constant 0 : i32
    %c0_i32_1 = arith.constant 0 : i32
    return %c0_i32, %c0_i32_0 : i32, i32
  }
  func.func @transform_4(%arg0: i32) -> (i32, i32) {
    %c0_i32 = arith.constant 0 : i32
    %c0_i32_0 = arith.constant 0 : i32
    return %arg0, %c0_i32 : i32, i32
  }
}

module attributes {stable_mosaic.version = 11 : i64} {
  func.func @_max4_kernel(%arg0: i32, %arg1: memref<104x16xf32, #tpu.memory_space<vmem>>, %arg2: memref<104x16xf32, #tpu.memory_space<vmem>>, %arg3: memref<104x16xf32, #tpu.memory_space<vmem>>, %arg4: memref<104x16xf32, #tpu.memory_space<vmem>>, %arg5: memref<104x16xf32, #tpu.memory_space<vmem>>) attributes {dimension_semantics = [#tpu.dimension_semantics<parallel>], iteration_bounds = array<i64: 1>, scalar_prefetch = 0 : i64, scratch_operands = 0 : i64, tpu.core_type = #tpu.core_type<tc>, window_params = [{transform_indices = @transform_0, window_bounds = array<i64: 104, 16>}, {transform_indices = @transform_1, window_bounds = array<i64: 104, 16>}, {transform_indices = @transform_2, window_bounds = array<i64: 104, 16>}, {transform_indices = @transform_3, window_bounds = array<i64: 104, 16>}, {transform_indices = @transform_4, window_bounds = array<i64: 104, 16>}]} {
    %c0 = arith.constant 0 : index
    %c0_0 = arith.constant 0 : index
    %0 = vector.load %arg1[%c0, %c0_0] : memref<104x16xf32, #tpu.memory_space<vmem>>, vector<104x16xf32>
    %c0_1 = arith.constant 0 : index
    %c0_2 = arith.constant 0 : index
    %1 = vector.load %arg2[%c0_1, %c0_2] : memref<104x16xf32, #tpu.memory_space<vmem>>, vector<104x16xf32>
    %2 = arith.maximumf %0, %1 : vector<104x16xf32>
    %c0_3 = arith.constant 0 : index
    %c0_4 = arith.constant 0 : index
    %3 = vector.load %arg3[%c0_3, %c0_4] : memref<104x16xf32, #tpu.memory_space<vmem>>, vector<104x16xf32>
    %c0_5 = arith.constant 0 : index
    %c0_6 = arith.constant 0 : index
    %4 = vector.load %arg4[%c0_5, %c0_6] : memref<104x16xf32, #tpu.memory_space<vmem>>, vector<104x16xf32>
    %5 = arith.maximumf %3, %4 : vector<104x16xf32>
    %6 = arith.maximumf %2, %5 : vector<104x16xf32>
    %c0_7 = arith.constant 0 : index
    %c0_8 = arith.constant 0 : index
    %7 = vector.load %arg5[%c0_7, %c0_8] : memref<104x16xf32, #tpu.memory_space<vmem>>, vector<104x16xf32>
    tpu.vector_store %arg5[%c0_7, %c0_8], %6 {strides = array<i32>} : memref<104x16xf32, #tpu.memory_space<vmem>>, vector<104x16xf32>,
    return
  }
  func.func @transform_0(%arg0: i32) -> (i32, i32) {
    %c0_i32 = arith.constant 0 : i32
    %c0_i32_0 = arith.constant 0 : i32
    return %arg0, %c0_i32 : i32, i32
  }
  func.func @transform_1(%arg0: i32) -> (i32, i32) {
    %c0_i32 = arith.constant 0 : i32
    %c0_i32_0 = arith.constant 0 : i32
    return %arg0, %c0_i32 : i32, i32
  }
  func.func @transform_2(%arg0: i32) -> (i32, i32) {
    %c0_i32 = arith.constant 0 : i32
    %c0_i32_0 = arith.constant 0 : i32
    return %arg0, %c0_i32 : i32, i32
  }
  func.func @transform_3(%arg0: i32) -> (i32, i32) {
    %c0_i32 = arith.constant 0 : i32
    %c0_i32_0 = arith.constant 0 : i32
    return %arg0, %c0_i32 : i32, i32
  }
  func.func @transform_4(%arg0: i32) -> (i32, i32) {
    %c0_i32 = arith.constant 0 : i32
    %c0_i32_0 = arith.constant 0 : i32
    return %arg0, %c0_i32 : i32, i32
  }
}

module attributes {stable_mosaic.version = 11 : i64} {
  func.func @_conv_prelu_kernel(%arg0: i32, %arg1: memref<56x144xbf16, #tpu.memory_space<vmem>>, %arg2: memref<144x16xbf16, #tpu.memory_space<vmem>>, %arg3: memref<1x16xf32, #tpu.memory_space<vmem>>, %arg4: memref<1x16xf32, #tpu.memory_space<vmem>>, %arg5: memref<56x16xf32, #tpu.memory_space<vmem>>) attributes {dimension_semantics = [#tpu.dimension_semantics<parallel>], iteration_bounds = array<i64: 1>, scalar_prefetch = 0 : i64, scratch_operands = 0 : i64, tpu.core_type = #tpu.core_type<tc>, window_params = [{transform_indices = @transform_0, window_bounds = array<i64: 56, 144>}, {pipeline_mode = #tpu.pipeline_mode<synchronous>, transform_indices = @transform_1, window_bounds = array<i64: 144, 16>}, {pipeline_mode = #tpu.pipeline_mode<synchronous>, transform_indices = @transform_2, window_bounds = array<i64: 1, 16>}, {pipeline_mode = #tpu.pipeline_mode<synchronous>, transform_indices = @transform_3, window_bounds = array<i64: 1, 16>}, {transform_indices = @transform_4, window_bounds = array<i64: 56, 16>}]} {
    %c0 = arith.constant 0 : index
    %c0_0 = arith.constant 0 : index
    %0 = vector.load %arg1[%c0, %c0_0] : memref<56x144xbf16, #tpu.memory_space<vmem>>, vector<56x144xbf16>
    %c0_1 = arith.constant 0 : index
    %c0_2 = arith.constant 0 : index
    %1 = vector.load %arg2[%c0_1, %c0_2] : memref<144x16xbf16, #tpu.memory_space<vmem>>, vector<144x16xbf16>
    %cst = arith.constant dense<0.000000e+00> : vector<56x16xf32>
    %2 = tpu.matmul %0, %1, %cst {dimension_numbers = #tpu.dot_dimension_numbers<[1], [0], [0], [1], [0, 0, 1, 1], [], []>} : vector<56x144xbf16>, vector<144x16xbf16>, vector<56x16xf32> -> vector<56x16xf32>
    %c0_3 = arith.constant 0 : index
    %c0_4 = arith.constant 0 : index
    %3 = vector.load %arg3[%c0_3, %c0_4] : memref<1x16xf32, #tpu.memory_space<vmem>>, vector<1x16xf32>
    %4 = vector.broadcast %3 : vector<1x16xf32> to vector<56x16xf32>
    %5 = arith.addf %2, %4 : vector<56x16xf32>
    %cst_5 = arith.constant 0.000000e+00 : f32
    %6 = vector.broadcast %cst_5 : f32 to vector<56x16xf32>
    %7 = arith.cmpf oge, %5, %6 : vector<56x16xf32>
    %c0_6 = arith.constant 0 : index
    %c0_7 = arith.constant 0 : index
    %8 = vector.load %arg4[%c0_6, %c0_7] : memref<1x16xf32, #tpu.memory_space<vmem>>, vector<1x16xf32>
    %9 = vector.broadcast %8 : vector<1x16xf32> to vector<56x16xf32>
    %10 = arith.mulf %9, %5 : vector<56x16xf32>
    %11 = arith.select %7, %5, %10 : vector<56x16xi1>, vector<56x16xf32>
    %c0_8 = arith.constant 0 : index
    %c0_9 = arith.constant 0 : index
    %12 = vector.load %arg5[%c0_8, %c0_9] : memref<56x16xf32, #tpu.memory_space<vmem>>, vector<56x16xf32>
    tpu.vector_store %arg5[%c0_8, %c0_9], %11 {strides = array<i32>} : memref<56x16xf32, #tpu.memory_space<vmem>>, vector<56x16xf32>,
    return
  }
  func.func @transform_0(%arg0: i32) -> (i32, i32) {
    %c0_i32 = arith.constant 0 : i32
    %c0_i32_0 = arith.constant 0 : i32
    return %arg0, %c0_i32 : i32, i32
  }
  func.func @transform_1(%arg0: i32) -> (i32, i32) {
    %c0_i32 = arith.constant 0 : i32
    %c0_i32_0 = arith.constant 0 : i32
    %c0_i32_1 = arith.constant 0 : i32
    return %c0_i32, %c0_i32_0 : i32, i32
  }
  func.func @transform_2(%arg0: i32) -> (i32, i32) {
    %c0_i32 = arith.constant 0 : i32
    %c0_i32_0 = arith.constant 0 : i32
    %c0_i32_1 = arith.constant 0 : i32
    return %c0_i32, %c0_i32_0 : i32, i32
  }
  func.func @transform_3(%arg0: i32) -> (i32, i32) {
    %c0_i32 = arith.constant 0 : i32
    %c0_i32_0 = arith.constant 0 : i32
    %c0_i32_1 = arith.constant 0 : i32
    return %c0_i32, %c0_i32_0 : i32, i32
  }
  func.func @transform_4(%arg0: i32) -> (i32, i32) {
    %c0_i32 = arith.constant 0 : i32
    %c0_i32_0 = arith.constant 0 : i32
    return %arg0, %c0_i32 : i32, i32
  }
}

module attributes {stable_mosaic.version = 11 : i64} {
  func.func @_softmax_rows_kernel(%arg0: i32, %arg1: memref<16x3xf32, #tpu.memory_space<vmem>>, %arg2: memref<16x3xf32, #tpu.memory_space<vmem>>) attributes {dimension_semantics = [#tpu.dimension_semantics<parallel>], iteration_bounds = array<i64: 1>, scalar_prefetch = 0 : i64, scratch_operands = 0 : i64, tpu.core_type = #tpu.core_type<tc>, window_params = [{transform_indices = @transform_0, window_bounds = array<i64: 16, 3>}, {transform_indices = @transform_1, window_bounds = array<i64: 16, 3>}]} {
    %c0 = arith.constant 0 : index
    %c0_0 = arith.constant 0 : index
    %0 = vector.load %arg1[%c0, %c0_0] : memref<16x3xf32, #tpu.memory_space<vmem>>, vector<16x3xf32>
    %cst = arith.constant dense<0xFF800000> : vector<16xf32>
    %1 = vector.multi_reduction <maximumf>, %0, %cst [1] : vector<16x3xf32> to vector<16xf32>
    %2 = vector.shape_cast %1 : vector<16xf32> to vector<16x1xf32>
    %3 = vector.broadcast %2 : vector<16x1xf32> to vector<16x3xf32>
    %4 = arith.subf %0, %3 : vector<16x3xf32>
    %5 = math.exp %4 : vector<16x3xf32>
    %cst_1 = arith.constant dense<0.000000e+00> : vector<16xf32>
    %6 = vector.multi_reduction <add>, %5, %cst_1 [1] : vector<16x3xf32> to vector<16xf32>
    %7 = vector.shape_cast %6 : vector<16xf32> to vector<16x1xf32>
    %8 = vector.broadcast %7 : vector<16x1xf32> to vector<16x3xf32>
    %9 = arith.divf %5, %8 : vector<16x3xf32>
    %c0_2 = arith.constant 0 : index
    %c0_3 = arith.constant 0 : index
    %10 = vector.load %arg2[%c0_2, %c0_3] : memref<16x3xf32, #tpu.memory_space<vmem>>, vector<16x3xf32>
    tpu.vector_store %arg2[%c0_2, %c0_3], %9 {strides = array<i32>} : memref<16x3xf32, #tpu.memory_space<vmem>>, vector<16x3xf32>,
    return
  }
  func.func @transform_0(%arg0: i32) -> (i32, i32) {
    %c0_i32 = arith.constant 0 : i32
    %c0_i32_0 = arith.constant 0 : i32
    return %arg0, %c0_i32 : i32, i32
  }
  func.func @transform_1(%arg0: i32) -> (i32, i32) {
    %c0_i32 = arith.constant 0 : i32
    %c0_i32_0 = arith.constant 0 : i32
    return %arg0, %c0_i32 : i32, i32
  }
}

module attributes {stable_mosaic.version = 11 : i64} {
  func.func @_conv3_heads_kernel(%arg0: i32, %arg1: memref<24x144xbf16, #tpu.memory_space<vmem>>, %arg2: memref<144x32xbf16, #tpu.memory_space<vmem>>, %arg3: memref<1x32xf32, #tpu.memory_space<vmem>>, %arg4: memref<1x32xf32, #tpu.memory_space<vmem>>, %arg5: memref<32x8xbf16, #tpu.memory_space<vmem>>, %arg6: memref<1x8xf32, #tpu.memory_space<vmem>>, %arg7: memref<24x8xf32, #tpu.memory_space<vmem>>) attributes {dimension_semantics = [#tpu.dimension_semantics<parallel>], iteration_bounds = array<i64: 1>, scalar_prefetch = 0 : i64, scratch_operands = 0 : i64, tpu.core_type = #tpu.core_type<tc>, window_params = [{transform_indices = @transform_0, window_bounds = array<i64: 24, 144>}, {pipeline_mode = #tpu.pipeline_mode<synchronous>, transform_indices = @transform_1, window_bounds = array<i64: 144, 32>}, {pipeline_mode = #tpu.pipeline_mode<synchronous>, transform_indices = @transform_2, window_bounds = array<i64: 1, 32>}, {pipeline_mode = #tpu.pipeline_mode<synchronous>, transform_indices = @transform_3, window_bounds = array<i64: 1, 32>}, {pipeline_mode = #tpu.pipeline_mode<synchronous>, transform_indices = @transform_4, window_bounds = array<i64: 32, 8>}, {pipeline_mode = #tpu.pipeline_mode<synchronous>, transform_indices = @transform_5, window_bounds = array<i64: 1, 8>}, {transform_indices = @transform_6, window_bounds = array<i64: 24, 8>}]} {
    %c0 = arith.constant 0 : index
    %c0_0 = arith.constant 0 : index
    %0 = vector.load %arg1[%c0, %c0_0] : memref<24x144xbf16, #tpu.memory_space<vmem>>, vector<24x144xbf16>
    %c0_1 = arith.constant 0 : index
    %c0_2 = arith.constant 0 : index
    %1 = vector.load %arg2[%c0_1, %c0_2] : memref<144x32xbf16, #tpu.memory_space<vmem>>, vector<144x32xbf16>
    %cst = arith.constant dense<0.000000e+00> : vector<24x32xf32>
    %2 = tpu.matmul %0, %1, %cst {dimension_numbers = #tpu.dot_dimension_numbers<[1], [0], [0], [1], [0, 0, 1, 1], [], []>} : vector<24x144xbf16>, vector<144x32xbf16>, vector<24x32xf32> -> vector<24x32xf32>
    %c0_3 = arith.constant 0 : index
    %c0_4 = arith.constant 0 : index
    %3 = vector.load %arg3[%c0_3, %c0_4] : memref<1x32xf32, #tpu.memory_space<vmem>>, vector<1x32xf32>
    %4 = vector.broadcast %3 : vector<1x32xf32> to vector<24x32xf32>
    %5 = arith.addf %2, %4 : vector<24x32xf32>
    %cst_5 = arith.constant 0.000000e+00 : f32
    %6 = vector.broadcast %cst_5 : f32 to vector<24x32xf32>
    %7 = arith.cmpf oge, %5, %6 : vector<24x32xf32>
    %c0_6 = arith.constant 0 : index
    %c0_7 = arith.constant 0 : index
    %8 = vector.load %arg4[%c0_6, %c0_7] : memref<1x32xf32, #tpu.memory_space<vmem>>, vector<1x32xf32>
    %9 = vector.broadcast %8 : vector<1x32xf32> to vector<24x32xf32>
    %10 = arith.mulf %9, %5 : vector<24x32xf32>
    %11 = arith.select %7, %5, %10 : vector<24x32xi1>, vector<24x32xf32>
    %12 = arith.truncf %11 : vector<24x32xf32> to vector<24x32xbf16>
    %c0_8 = arith.constant 0 : index
    %c0_9 = arith.constant 0 : index
    %13 = vector.load %arg5[%c0_8, %c0_9] : memref<32x8xbf16, #tpu.memory_space<vmem>>, vector<32x8xbf16>
    %cst_10 = arith.constant dense<0.000000e+00> : vector<24x8xf32>
    %14 = tpu.matmul %12, %13, %cst_10 {dimension_numbers = #tpu.dot_dimension_numbers<[1], [0], [0], [1], [0, 0, 1, 1], [], []>} : vector<24x32xbf16>, vector<32x8xbf16>, vector<24x8xf32> -> vector<24x8xf32>
    %c0_11 = arith.constant 0 : index
    %c0_12 = arith.constant 0 : index
    %15 = vector.load %arg6[%c0_11, %c0_12] : memref<1x8xf32, #tpu.memory_space<vmem>>, vector<1x8xf32>
    %16 = vector.broadcast %15 : vector<1x8xf32> to vector<24x8xf32>
    %17 = arith.addf %14, %16 : vector<24x8xf32>
    %c0_13 = arith.constant 0 : index
    %c0_14 = arith.constant 0 : index
    %18 = vector.load %arg7[%c0_13, %c0_14] : memref<24x8xf32, #tpu.memory_space<vmem>>, vector<24x8xf32>
    tpu.vector_store %arg7[%c0_13, %c0_14], %17 {strides = array<i32>} : memref<24x8xf32, #tpu.memory_space<vmem>>, vector<24x8xf32>,
    return
  }
  func.func @transform_0(%arg0: i32) -> (i32, i32) {
    %c0_i32 = arith.constant 0 : i32
    %c0_i32_0 = arith.constant 0 : i32
    return %arg0, %c0_i32 : i32, i32
  }
  func.func @transform_1(%arg0: i32) -> (i32, i32) {
    %c0_i32 = arith.constant 0 : i32
    %c0_i32_0 = arith.constant 0 : i32
    %c0_i32_1 = arith.constant 0 : i32
    return %c0_i32, %c0_i32_0 : i32, i32
  }
  func.func @transform_2(%arg0: i32) -> (i32, i32) {
    %c0_i32 = arith.constant 0 : i32
    %c0_i32_0 = arith.constant 0 : i32
    %c0_i32_1 = arith.constant 0 : i32
    return %c0_i32, %c0_i32_0 : i32, i32
  }
  func.func @transform_3(%arg0: i32) -> (i32, i32) {
    %c0_i32 = arith.constant 0 : i32
    %c0_i32_0 = arith.constant 0 : i32
    %c0_i32_1 = arith.constant 0 : i32
    return %c0_i32, %c0_i32_0 : i32, i32
  }
  func.func @transform_4(%arg0: i32) -> (i32, i32) {
    %c0_i32 = arith.constant 0 : i32
    %c0_i32_0 = arith.constant 0 : i32
    %c0_i32_1 = arith.constant 0 : i32
    return %c0_i32, %c0_i32_0 : i32, i32
  }
  func.func @transform_5(%arg0: i32) -> (i32, i32) {
    %c0_i32 = arith.constant 0 : i32
    %c0_i32_0 = arith.constant 0 : i32
    %c0_i32_1 = arith.constant 0 : i32
    return %c0_i32, %c0_i32_0 : i32, i32
  }
  func.func @transform_6(%arg0: i32) -> (i32, i32) {
    %c0_i32 = arith.constant 0 : i32
    %c0_i32_0 = arith.constant 0 : i32
    return %arg0, %c0_i32 : i32, i32
  }
}

</mosaic_0001>

<bundles_post_ra>
// kernel: pnet_forward.5
= control target key start
LH: loop header
LB: loop body
LE: loop exit
PB: predicated region body
PF: predicated region fallthrough
CT: control target
= control target key end

     0   :  { %v947_v0 = vmov 0.0   ;;  %vm948_vm0 = vmmov 0   ;;  %vm213_vm1 = vcmask 261120   ;;  %vm675_vm2 = vcmask 130048   ;;  %s1438_s1 = inlined_call_operand.vmem [shape: bf16[32,16], index: 1, kind: input, shape index: {}]   ;;  %s1439_s0 = inlined_call_operand.vmem [shape: bf16[392,32], index: 0, kind: input, shape index: {}]   ;;  %s1440_s2 = inlined_call_operand.vmem [shape: f32[1,16], index: 2, kind: input, shape index: {}]   ;;  %s1441_s3 = inlined_call_operand.vmem [shape: f32[1,16], index: 3, kind: input, shape index: {}]   ;;  %s1442_s4 = inlined_call_operand.vmem [shape: f32[392,16], index: 4, kind: output, shape index: {}]  }
   0x1   :  { %810 = vmatprep.subr.bf16.mxu0 %v947_v0  ;;  %v920_v1 = vld [vmem:[%s1438_s1] sm:$0xff]   ;;  %914 = vmatprep.subr.bf16.mxu1 %v947_v0  ;;  %v921_v2 = vld [vmem:[%s1438_s1 + $0x8] sm:$0xff]   ;;  %v925_v6 = vld [vmem:[%s1439_s0 + $0x70] sm:$0xff]  }
   0x2   :  { %814 = vmatprep.mubr.msk.bf16.mxu0 %vm948_vm0, %v947_v0  ;;  %866 = vmatprep.mubr.msk.bf16.mxu1 %vm948_vm0, %v947_v0  ;;  %v922_v3 = vld [vmem:[%s1439_s0] sm:$0xff]   ;;  %v923_v4 = vld [vmem:[%s1439_s0 + $0x68] sm:$0xff]   ;;  %v926_v7 = vld [vmem:[%s1439_s0 + $0x10] sm:$0xff]  }
   0x3   :  { %811 = vmatpush3.bf16.msra.mxu0 %v920_v1  ;;  %916 = vmatpush3.bf16.msra.mxu1 %v920_v1  ;;  %v924_v5 = vld [vmem:[%s1439_s0 + $0x8] sm:$0xff]   ;;  %v927_v8 = vld [vmem:[%s1439_s0 + $0x78] sm:$0xff]   ;;  %v929_v10 = vld [vmem:[%s1439_s0 + $0x80] sm:$0xff]  }
   0x4   :  { %812 = vmatprep.subr.bf16.mxu0 %v947_v0  ;;  %915 = vmatprep.subr.bf16.mxu1 %v947_v0  ;;  %v928_v9 = vld [vmem:[%s1439_s0 + $0x18] sm:$0xff]   ;;  %v930_v11 = vld [vmem:[%s1439_s0 + $0x20] sm:$0xff]   ;;  %v931_v12 = vld [vmem:[%s1439_s0 + $0x88] sm:$0xff]  }
   0x5   :  { %v932_v13 = vld [vmem:[%s1439_s0 + $0x28] sm:$0xff]   ;;  %v933_v14 = vld [vmem:[%s1439_s0 + $0x90] sm:$0xff]   ;;  %v935_v16 = vld [vmem:[%s1439_s0 + $0x98] sm:$0xff]  }
   0x6   :  { %v934_v15 = vld [vmem:[%s1439_s0 + $0x30] sm:$0xff]   ;;  %v936_v17 = vld [vmem:[%s1439_s0 + $0x38] sm:$0xff]   ;;  %v937_v18 = vld [vmem:[%s1439_s0 + $0xa0] sm:$0xff]  }
   0x7   :  { %813 = vmatpush3.bf16.msra.mxu0 %v921_v2  ;;  %917 = vmatpush3.bf16.msra.mxu1 %v921_v2  ;;  %v938_v19 = vld [vmem:[%s1439_s0 + $0x40] sm:$0xff]   ;;  %v939_v20 = vld [vmem:[%s1439_s0 + $0xa8] sm:$0xff]   ;;  %v941_v22 = vld [vmem:[%s1439_s0 + $0xb0] sm:$0xff]  }
   0x8   :  { %v940_v21 = vld [vmem:[%s1439_s0 + $0x48] sm:$0xff]   ;;  %v942_v23 = vld [vmem:[%s1439_s0 + $0x50] sm:$0xff]   ;;  %v943_v24 = vld [vmem:[%s1439_s0 + $0xb8] sm:$0xff]  }
   0x9   :  { %v944_v25 = vld [vmem:[%s1439_s0 + $0x58] sm:$0xff]   ;;  %v945_v26 = vld [vmem:[%s1439_s0 + $0xc0] ss:$0 sps:$4 sm:$0xff]  }
   0xa   :  { %815 = vmatmul.mubr.msk.bf16.vlgmr.msra.gmra.mrb[0].mxu0 %vm213_vm1, %v922_v3  ;;  %867 = vmatmul.mubr.msk.bf16.vlgmr.msra.gmra.mrb[0].mxu1 %vm213_vm1, %v923_v4  ;;  %v946_v27 = vld [vmem:[%s1439_s0 + $0x60] sm:$0xff]  }
   0xb   :  { %818 = vmatprep.mubr.msk.bf16.mxu0 %vm948_vm0, %v947_v0  ;;  %870 = vmatprep.mubr.msk.bf16.mxu1 %vm948_vm0, %v947_v0  ;;  %v1137_v28 = vld [vmem:[%s1440_s2] ss:$0 sm:$0xff] }
   0xc   :  { %v1142_v30 = vld [vmem:[%s1441_s3] ss:$0 sm:$0xff] }
  0x12   :  { %819 = vmatmul.mubr.msk.bf16.gmra.mrb[4].mxu0 %vm213_vm1, %v924_v5  ;;  %871 = vmatmul.mubr.msk.bf16.gmra.mrb[4].mxu1 %vm213_vm1, %v925_v6 }
  0x13   :  { %822 = vmatprep.mubr.msk.bf16.mxu0 %vm948_vm0, %v947_v0  ;;  %874 = vmatprep.mubr.msk.bf16.mxu1 %vm948_vm0, %v947_v0 }
  0x1a   :  { %823 = vmatmul.mubr.msk.bf16.gmra.mrb[8].mxu0 %vm213_vm1, %v926_v7  ;;  %875 = vmatmul.mubr.msk.bf16.gmra.mrb[8].mxu1 %vm213_vm1, %v927_v8 }
  0x1b   :  { %826 = vmatprep.mubr.msk.bf16.mxu0 %vm948_vm0, %v947_v0  ;;  %878 = vmatprep.mubr.msk.bf16.mxu1 %vm948_vm0, %v947_v0 }
  0x22   :  { %827 = vmatmul.mubr.msk.bf16.gmra.mrb[12].mxu0 %vm213_vm1, %v928_v9  ;;  %879 = vmatmul.mubr.msk.bf16.gmra.mrb[12].mxu1 %vm213_vm1, %v929_v10 }
  0x23   :  { %830 = vmatprep.mubr.msk.bf16.mxu0 %vm948_vm0, %v947_v0  ;;  %882 = vmatprep.mubr.msk.bf16.mxu1 %vm948_vm0, %v947_v0 }
  0x2a   :  { %831 = vmatmul.mubr.msk.bf16.gmra.mrb[16].mxu0 %vm213_vm1, %v930_v11  ;;  %883 = vmatmul.mubr.msk.bf16.gmra.mrb[16].mxu1 %vm213_vm1, %v931_v12 }
  0x2b   :  { %834 = vmatprep.mubr.msk.bf16.mxu0 %vm948_vm0, %v947_v0  ;;  %886 = vmatprep.mubr.msk.bf16.mxu1 %vm948_vm0, %v947_v0 }
  0x32   :  { %835 = vmatmul.mubr.msk.bf16.gmra.mrb[20].mxu0 %vm213_vm1, %v932_v13  ;;  %887 = vmatmul.mubr.msk.bf16.gmra.mrb[20].mxu1 %vm213_vm1, %v933_v14 }
  0x33   :  { %838 = vmatprep.mubr.msk.bf16.mxu0 %vm948_vm0, %v947_v0  ;;  %890 = vmatprep.mubr.msk.bf16.mxu1 %vm948_vm0, %v947_v0 }
  0x3a   :  { %839 = vmatmul.mubr.msk.bf16.gmra.mrb[24].mxu0 %vm213_vm1, %v934_v15  ;;  %891 = vmatmul.mubr.msk.bf16.gmra.mrb[24].mxu1 %vm213_vm1, %v935_v16 }
  0x3b   :  { %842 = vmatprep.mubr.msk.bf16.mxu0 %vm948_vm0, %v947_v0  ;;  %894 = vmatprep.mubr.msk.bf16.mxu1 %vm948_vm0, %v947_v0 }
  0x42   :  { %843 = vmatmul.mubr.msk.bf16.gmra.mrb[28].mxu0 %vm213_vm1, %v936_v17  ;;  %895 = vmatmul.mubr.msk.bf16.gmra.mrb[28].mxu1 %vm213_vm1, %v937_v18 }
  0x43   :  { %846 = vmatprep.mubr.msk.bf16.mxu0 %vm948_vm0, %v947_v0  ;;  %898 = vmatprep.mubr.msk.bf16.mxu1 %vm948_vm0, %v947_v0 }
  0x4a   :  { %847 = vmatmul.mubr.msk.bf16.gmra.mrb[32].mxu0 %vm213_vm1, %v938_v19  ;;  %899 = vmatmul.mubr.msk.bf16.gmra.mrb[32].mxu1 %vm213_vm1, %v939_v20 }
  0x4b   :  { %850 = vmatprep.mubr.msk.bf16.mxu0 %vm948_vm0, %v947_v0  ;;  %902 = vmatprep.mubr.msk.bf16.mxu1 %vm948_vm0, %v947_v0 }
  0x52   :  { %851 = vmatmul.mubr.msk.bf16.gmra.mrb[36].mxu0 %vm213_vm1, %v940_v21  ;;  %903 = vmatmul.mubr.msk.bf16.gmra.mrb[36].mxu1 %vm213_vm1, %v941_v22 }
  0x53   :  { %854 = vmatprep.mubr.msk.bf16.mxu0 %vm948_vm0, %v947_v0  ;;  %906 = vmatprep.mubr.msk.bf16.mxu1 %vm948_vm0, %v947_v0 }
  0x5a   :  { %855 = vmatmul.mubr.msk.bf16.gmra.mrb[40].mxu0 %vm213_vm1, %v942_v23  ;;  %907 = vmatmul.mubr.msk.bf16.gmra.mrb[40].mxu1 %vm213_vm1, %v943_v24 }
  0x5b   :  { %858 = vmatprep.mubr.msk.bf16.mxu0 %vm948_vm0, %v947_v0  ;;  %910 = vmatprep.mubr.msk.bf16.mxu1 %vm948_vm0, %v947_v0 }
  0x62   :  { %859 = vmatmul.mubr.msk.bf16.gmra.mrb[44].mxu0 %vm213_vm1, %v944_v25  ;;  %911 = vmatmul.mubr.msk.bf16.gmra.mrb[44].mxu1 %vm213_vm1, %v945_v26 }
  0x63   :  { %862 = vmatprep.mubr.msk.bf16.mxu0 %vm948_vm0, %v947_v0 }
  0x6a   :  { %863 = vmatmul.mubr.msk.bf16.gmra.mrb[48].mxu0 %vm213_vm1, %v946_v27 }
  0xdd   :  { %v323_v29 = vpop.f32.mrb[0].mxu0  ;;  %v427_v31 = vpop.f32.mrb[0].mxu1 }
  0xde   :  { %v324_v32 = vadd.f32 %v1137_v28, %v323_v29  ;;  %v816_v33 = vpop.f32.mrb[1].mxu0  ;;  %v428_v34 = vadd.f32 %v1137_v28, %v427_v31  ;;  %v868_v35 = vpop.f32.mrb[1].mxu1 }
  0xdf   :  { %v326_v36 = vpop.f32.mrb[2].mxu0  ;;  %v430_v37 = vpop.f32.mrb[2].mxu1 }
  0xe0   :  { %vm521_vm3 = vcmp.ge.f32.partialorder %v324_v32, 0.0  ;;  %v577_v38 = vmul.f32 %v1142_v30, %v324_v32  ;;  %v327_v39 = vadd.f32 %v1137_v28, %v326_v36  ;;  %v817_v40 = vpop.f32.mrb[3].mxu0  ;;  %vm547_vm4 = vcmp.ge.f32.partialorder %v428_v34, 0.0  ;;  %v869_v41 = vpop.f32.mrb[3].mxu1 }
  0xe1   :  { %v603_v42 = vmul.f32 %v1142_v30, %v428_v34  ;;  %v431_v43 = vadd.f32 %v1137_v28, %v430_v37 }
  0xe2   :  { %v626_v44 = vsel %vm521_vm3, %v324_v32, %v577_v38  ;;  %vm522_vm5 = vcmp.ge.f32.partialorder %v327_v39, 0.0  ;;  %v578_v45 = vmul.f32 %v1142_v30, %v327_v39 }
  0xe3   :  { %676 = vst.msk [vmem:[%s1442_s4] sm:$0xff] %vm675_vm2, %v626_v44  ;;  %v652_v46 = vsel %vm547_vm4, %v428_v34, %v603_v42  ;;  %vm548_vm6 = vcmp.ge.f32.partialorder %v431_v43, 0.0  ;;  %v604_v47 = vmul.f32 %v1142_v30, %v431_v43 }
  0xe4   :  { %v627_v48 = vsel %vm522_vm5, %v327_v39, %v578_v45  ;;  %702 = vst.msk [vmem:[%s1442_s4 + $0xd0] sm:$0xff] %vm675_vm2, %v652_v46 }
  0xe5   :  { %677 = vst.msk [vmem:[%s1442_s4 + $0x8] sm:$0xff] %vm675_vm2, %v627_v48  ;;  %v331_v49 = vpop.f32.mrb[4].mxu0  ;;  %v653_v50 = vsel %vm548_vm6, %v431_v43, %v604_v47  ;;  %v435_v51 = vpop.f32.mrb[4].mxu1 }
  0xe6   :  { %v332_v52 = vadd.f32 %v1137_v28, %v331_v49  ;;  %703 = vst.msk [vmem:[%s1442_s4 + $0xd8] sm:$0xff] %vm675_vm2, %v653_v50  ;;  %v820_v53 = vpop.f32.mrb[5].mxu0  ;;  %v436_v54 = vadd.f32 %v1137_v28, %v435_v51  ;;  %v872_v55 = vpop.f32.mrb[5].mxu1 }
  0xe7   :  { %v334_v56 = vpop.f32.mrb[6].mxu0  ;;  %v438_v57 = vpop.f32.mrb[6].mxu1 }
  0xe8   :  { %vm523_vm7 = vcmp.ge.f32.partialorder %v332_v52, 0.0  ;;  %v579_v58 = vmul.f32 %v1142_v30, %v332_v52  ;;  %v335_v59 = vadd.f32 %v1137_v28, %v334_v56  ;;  %v821_v60 = vpop.f32.mrb[7].mxu0  ;;  %vm549_vm8 = vcmp.ge.f32.partialorder %v436_v54, 0.0  ;;  %v873_v61 = vpop.f32.mrb[7].mxu1 }
  0xe9   :  { %v605_v62 = vmul.f32 %v1142_v30, %v436_v54  ;;  %v439_v63 = vadd.f32 %v1137_v28, %v438_v57 }
  0xea   :  { %v628_v0 = vsel %vm523_vm7, %v332_v52, %v579_v58  ;;  %vm524_vm9 = vcmp.ge.f32.partialorder %v335_v59, 0.0  ;;  %v580_v1 = vmul.f32 %v1142_v30, %v335_v59 }
  0xeb   :  { %678 = vst.msk [vmem:[%s1442_s4 + $0x10] sm:$0xff] %vm675_vm2, %v628_v0  ;;  %v654_v2 = vsel %vm549_vm8, %v436_v54, %v605_v62  ;;  %vm550_vm10 = vcmp.ge.f32.partialorder %v439_v63, 0.0  ;;  %v606_v3 = vmul.f32 %v1142_v30, %v439_v63 }
  0xec   :  { %v629_v4 = vsel %vm524_vm9, %v335_v59, %v580_v1  ;;  %704 = vst.msk [vmem:[%s1442_s4 + $0xe0] sm:$0xff] %vm675_vm2, %v654_v2 }
  0xed   :  { %679 = vst.msk [vmem:[%s1442_s4 + $0x18] sm:$0xff] %vm675_vm2, %v629_v4  ;;  %v339_v5 = vpop.f32.mrb[8].mxu0  ;;  %v655_v6 = vsel %vm550_vm10, %v439_v63, %v606_v3  ;;  %v443_v7 = vpop.f32.mrb[8].mxu1 }
  0xee   :  { %v340_v8 = vadd.f32 %v1137_v28, %v339_v5  ;;  %705 = vst.msk [vmem:[%s1442_s4 + $0xe8] sm:$0xff] %vm675_vm2, %v655_v6  ;;  %v824_v9 = vpop.f32.mrb[9].mxu0  ;;  %v444_v10 = vadd.f32 %v1137_v28, %v443_v7  ;;  %v876_v11 = vpop.f32.mrb[9].mxu1 }
  0xef   :  { %v342_v12 = vpop.f32.mrb[10].mxu0  ;;  %v446_v13 = vpop.f32.mrb[10].mxu1 }
  0xf0   :  { %vm525_vm11 = vcmp.ge.f32.partialorder %v340_v8, 0.0  ;;  %v581_v14 = vmul.f32 %v1142_v30, %v340_v8  ;;  %v343_v15 = vadd.f32 %v1137_v28, %v342_v12  ;;  %v825_v16 = vpop.f32.mrb[11].mxu0  ;;  %vm551_vm12 = vcmp.ge.f32.partialorder %v444_v10, 0.0  ;;  %v877_v17 = vpop.f32.mrb[11].mxu1 }
  0xf1   :  { %v607_v18 = vmul.f32 %v1142_v30, %v444_v10  ;;  %v447_v19 = vadd.f32 %v1137_v28, %v446_v13 }
  0xf2   :  { %v630_v20 = vsel %vm525_vm11, %v340_v8, %v581_v14  ;;  %vm526_vm13 = vcmp.ge.f32.partialorder %v343_v15, 0.0  ;;  %v582_v21 = vmul.f32 %v1142_v30, %v343_v15 }
  0xf3   :  { %680 = vst.msk [vmem:[%s1442_s4 + $0x20] sm:$0xff] %vm675_vm2, %v630_v20  ;;  %v656_v22 = vsel %vm551_vm12, %v444_v10, %v607_v18  ;;  %vm552_vm14 = vcmp.ge.f32.partialorder %v447_v19, 0.0  ;;  %v608_v23 = vmul.f32 %v1142_v30, %v447_v19 }
  0xf4   :  { %v631_v24 = vsel %vm526_vm13, %v343_v15, %v582_v21  ;;  %706 = vst.msk [vmem:[%s1442_s4 + $0xf0] sm:$0xff] %vm675_vm2, %v656_v22 }
  0xf5   :  { %681 = vst.msk [vmem:[%s1442_s4 + $0x28] sm:$0xff] %vm675_vm2, %v631_v24  ;;  %v347_v25 = vpop.f32.mrb[12].mxu0  ;;  %v657_v26 = vsel %vm552_vm14, %v447_v19, %v608_v23  ;;  %v451_v27 = vpop.f32.mrb[12].mxu1 }
  0xf6   :  { %v348_v29 = vadd.f32 %v1137_v28, %v347_v25  ;;  %707 = vst.msk [vmem:[%s1442_s4 + $0xf8] sm:$0xff] %vm675_vm2, %v657_v26  ;;  %v828_v31 = vpop.f32.mrb[13].mxu0  ;;  %v452_v32 = vadd.f32 %v1137_v28, %v451_v27  ;;  %v880_v33 = vpop.f32.mrb[13].mxu1 }
  0xf7   :  { %v350_v34 = vpop.f32.mrb[14].mxu0  ;;  %v454_v35 = vpop.f32.mrb[14].mxu1 }
  0xf8   :  { %vm527_vm15 = vcmp.ge.f32.partialorder %v348_v29, 0.0  ;;  %v583_v36 = vmul.f32 %v1142_v30, %v348_v29  ;;  %v351_v37 = vadd.f32 %v1137_v28, %v350_v34  ;;  %v829_v38 = vpop.f32.mrb[15].mxu0  ;;  %vm553_vm0 = vcmp.ge.f32.partialorder %v452_v32, 0.0  ;;  %v881_v39 = vpop.f32.mrb[15].mxu1 }
  0xf9   :  { %v609_v40 = vmul.f32 %v1142_v30, %v452_v32  ;;  %v455_v41 = vadd.f32 %v1137_v28, %v454_v35 }
  0xfa   :  { %v632_v42 = vsel %vm527_vm15, %v348_v29, %v583_v36  ;;  %vm528_vm1 = vcmp.ge.f32.partialorder %v351_v37, 0.0  ;;  %v584_v43 = vmul.f32 %v1142_v30, %v351_v37 }
  0xfb   :  { %682 = vst.msk [vmem:[%s1442_s4 + $0x30] sm:$0xff] %vm675_vm2, %v632_v42  ;;  %v658_v44 = vsel %vm553_vm0, %v452_v32, %v609_v40  ;;  %vm554_vm3 = vcmp.ge.f32.partialorder %v455_v41, 0.0  ;;  %v610_v45 = vmul.f32 %v1142_v30, %v455_v41 }
  0xfc   :  { %v633_v46 = vsel %vm528_vm1, %v351_v37, %v584_v43  ;;  %708 = vst.msk [vmem:[%s1442_s4 + $0x100] sm:$0xff] %vm675_vm2, %v658_v44 }
  0xfd   :  { %683 = vst.msk [vmem:[%s1442_s4 + $0x38] sm:$0xff] %vm675_vm2, %v633_v46  ;;  %v355_v47 = vpop.f32.mrb[16].mxu0  ;;  %v659_v48 = vsel %vm554_vm3, %v455_v41, %v610_v45  ;;  %v459_v49 = vpop.f32.mrb[16].mxu1 }
  0xfe   :  { %v356_v50 = vadd.f32 %v1137_v28, %v355_v47  ;;  %709 = vst.msk [vmem:[%s1442_s4 + $0x108] sm:$0xff] %vm675_vm2, %v659_v48  ;;  %v832_v51 = vpop.f32.mrb[17].mxu0  ;;  %v460_v52 = vadd.f32 %v1137_v28, %v459_v49  ;;  %v884_v53 = vpop.f32.mrb[17].mxu1 }
  0xff   :  { %v358_v54 = vpop.f32.mrb[18].mxu0  ;;  %v462_v55 = vpop.f32.mrb[18].mxu1 }
 0x100   :  { %vm529_vm4 = vcmp.ge.f32.partialorder %v356_v50, 0.0  ;;  %v585_v56 = vmul.f32 %v1142_v30, %v356_v50  ;;  %v359_v57 = vadd.f32 %v1137_v28, %v358_v54  ;;  %v833_v58 = vpop.f32.mrb[19].mxu0  ;;  %vm555_vm5 = vcmp.ge.f32.partialorder %v460_v52, 0.0  ;;  %v885_v59 = vpop.f32.mrb[19].mxu1 }
 0x101   :  { %v611_v60 = vmul.f32 %v1142_v30, %v460_v52  ;;  %v463_v61 = vadd.f32 %v1137_v28, %v462_v55 }
 0x102   :  { %v634_v62 = vsel %vm529_vm4, %v356_v50, %v585_v56  ;;  %vm530_vm6 = vcmp.ge.f32.partialorder %v359_v57, 0.0  ;;  %v586_v63 = vmul.f32 %v1142_v30, %v359_v57 }
 0x103   :  { %684 = vst.msk [vmem:[%s1442_s4 + $0x40] sm:$0xff] %vm675_vm2, %v634_v62  ;;  %v660_v0 = vsel %vm555_vm5, %v460_v52, %v611_v60  ;;  %vm556_vm7 = vcmp.ge.f32.partialorder %v463_v61, 0.0  ;;  %v612_v1 = vmul.f32 %v1142_v30, %v463_v61 }
 0x104   :  { %v635_v2 = vsel %vm530_vm6, %v359_v57, %v586_v63  ;;  %710 = vst.msk [vmem:[%s1442_s4 + $0x110] sm:$0xff] %vm675_vm2, %v660_v0 }
 0x105   :  { %685 = vst.msk [vmem:[%s1442_s4 + $0x48] sm:$0xff] %vm675_vm2, %v635_v2  ;;  %v363_v3 = vpop.f32.mrb[20].mxu0  ;;  %v661_v4 = vsel %vm556_vm7, %v463_v61, %v612_v1  ;;  %v467_v5 = vpop.f32.mrb[20].mxu1 }
 0x106   :  { %v364_v6 = vadd.f32 %v1137_v28, %v363_v3  ;;  %711 = vst.msk [vmem:[%s1442_s4 + $0x118] sm:$0xff] %vm675_vm2, %v661_v4  ;;  %v836_v7 = vpop.f32.mrb[21].mxu0  ;;  %v468_v8 = vadd.f32 %v1137_v28, %v467_v5  ;;  %v888_v9 = vpop.f32.mrb[21].mxu1 }
 0x107   :  { %v366_v10 = vpop.f32.mrb[22].mxu0  ;;  %v470_v11 = vpop.f32.mrb[22].mxu1 }
 0x108   :  { %vm531_vm8 = vcmp.ge.f32.partialorder %v364_v6, 0.0  ;;  %v587_v12 = vmul.f32 %v1142_v30, %v364_v6  ;;  %v367_v13 = vadd.f32 %v1137_v28, %v366_v10  ;;  %v837_v14 = vpop.f32.mrb[23].mxu0  ;;  %vm557_vm9 = vcmp.ge.f32.partialorder %v468_v8, 0.0  ;;  %v889_v15 = vpop.f32.mrb[23].mxu1 }
 0x109   :  { %v613_v16 = vmul.f32 %v1142_v30, %v468_v8  ;;  %v471_v17 = vadd.f32 %v1137_v28, %v470_v11 }
 0x10a   :  { %v636_v18 = vsel %vm531_vm8, %v364_v6, %v587_v12  ;;  %vm532_vm10 = vcmp.ge.f32.partialorder %v367_v13, 0.0  ;;  %v588_v19 = vmul.f32 %v1142_v30, %v367_v13 }
 0x10b   :  { %686 = vst.msk [vmem:[%s1442_s4 + $0x50] sm:$0xff] %vm675_vm2, %v636_v18  ;;  %v662_v20 = vsel %vm557_vm9, %v468_v8, %v613_v16  ;;  %vm558_vm11 = vcmp.ge.f32.partialorder %v471_v17, 0.0  ;;  %v614_v21 = vmul.f32 %v1142_v30, %v471_v17 }
 0x10c   :  { %v637_v22 = vsel %vm532_vm10, %v367_v13, %v588_v19  ;;  %712 = vst.msk [vmem:[%s1442_s4 + $0x120] sm:$0xff] %vm675_vm2, %v662_v20 }
 0x10d   :  { %687 = vst.msk [vmem:[%s1442_s4 + $0x58] sm:$0xff] %vm675_vm2, %v637_v22  ;;  %v371_v23 = vpop.f32.mrb[24].mxu0  ;;  %v663_v24 = vsel %vm558_vm11, %v471_v17, %v614_v21  ;;  %v475_v25 = vpop.f32.mrb[24].mxu1 }
 0x10e   :  { %v372_v26 = vadd.f32 %v1137_v28, %v371_v23  ;;  %713 = vst.msk [vmem:[%s1442_s4 + $0x128] sm:$0xff] %vm675_vm2, %v663_v24  ;;  %v840_v27 = vpop.f32.mrb[25].mxu0  ;;  %v476_v29 = vadd.f32 %v1137_v28, %v475_v25  ;;  %v892_v31 = vpop.f32.mrb[25].mxu1 }
 0x10f   :  { %v374_v32 = vpop.f32.mrb[26].mxu0  ;;  %v478_v33 = vpop.f32.mrb[26].mxu1 }
 0x110   :  { %vm533_vm12 = vcmp.ge.f32.partialorder %v372_v26, 0.0  ;;  %v589_v34 = vmul.f32 %v1142_v30, %v372_v26  ;;  %v375_v35 = vadd.f32 %v1137_v28, %v374_v32  ;;  %v841_v36 = vpop.f32.mrb[27].mxu0  ;;  %vm559_vm13 = vcmp.ge.f32.partialorder %v476_v29, 0.0  ;;  %v893_v37 = vpop.f32.mrb[27].mxu1 }
 0x111   :  { %v615_v38 = vmul.f32 %v1142_v30, %v476_v29  ;;  %v479_v39 = vadd.f32 %v1137_v28, %v478_v33 }
 0x112   :  { %v638_v40 = vsel %vm533_vm12, %v372_v26, %v589_v34  ;;  %vm534_vm14 = vcmp.ge.f32.partialorder %v375_v35, 0.0  ;;  %v590_v41 = vmul.f32 %v1142_v30, %v375_v35 }
 0x113   :  { %688 = vst.msk [vmem:[%s1442_s4 + $0x60] sm:$0xff] %vm675_vm2, %v638_v40  ;;  %v664_v42 = vsel %vm559_vm13, %v476_v29, %v615_v38  ;;  %vm560_vm15 = vcmp.ge.f32.partialorder %v479_v39, 0.0  ;;  %v616_v43 = vmul.f32 %v1142_v30, %v479_v39 }
 0x114   :  { %v639_v44 = vsel %vm534_vm14, %v375_v35, %v590_v41  ;;  %714 = vst.msk [vmem:[%s1442_s4 + $0x130] sm:$0xff] %vm675_vm2, %v664_v42 }
 0x115   :  { %689 = vst.msk [vmem:[%s1442_s4 + $0x68] sm:$0xff] %vm675_vm2, %v639_v44  ;;  %v379_v45 = vpop.f32.mrb[28].mxu0  ;;  %v665_v46 = vsel %vm560_vm15, %v479_v39, %v616_v43  ;;  %v483_v47 = vpop.f32.mrb[28].mxu1 }
 0x116   :  { %v380_v48 = vadd.f32 %v1137_v28, %v379_v45  ;;  %715 = vst.msk [vmem:[%s1442_s4 + $0x138] sm:$0xff] %vm675_vm2, %v665_v46  ;;  %v844_v49 = vpop.f32.mrb[29].mxu0  ;;  %v484_v50 = vadd.f32 %v1137_v28, %v483_v47  ;;  %v896_v51 = vpop.f32.mrb[29].mxu1 }
 0x117   :  { %v382_v52 = vpop.f32.mrb[30].mxu0  ;;  %v486_v53 = vpop.f32.mrb[30].mxu1 }
 0x118   :  { %vm535_vm0 = vcmp.ge.f32.partialorder %v380_v48, 0.0  ;;  %v591_v54 = vmul.f32 %v1142_v30, %v380_v48  ;;  %v383_v55 = vadd.f32 %v1137_v28, %v382_v52  ;;  %v845_v56 = vpop.f32.mrb[31].mxu0  ;;  %vm561_vm1 = vcmp.ge.f32.partialorder %v484_v50, 0.0  ;;  %v897_v57 = vpop.f32.mrb[31].mxu1 }
 0x119   :  { %v617_v58 = vmul.f32 %v1142_v30, %v484_v50  ;;  %v487_v59 = vadd.f32 %v1137_v28, %v486_v53 }
 0x11a   :  { %v640_v60 = vsel %vm535_vm0, %v380_v48, %v591_v54  ;;  %vm536_vm3 = vcmp.ge.f32.partialorder %v383_v55, 0.0  ;;  %v592_v61 = vmul.f32 %v1142_v30, %v383_v55 }
 0x11b   :  { %690 = vst.msk [vmem:[%s1442_s4 + $0x70] sm:$0xff] %vm675_vm2, %v640_v60  ;;  %v666_v62 = vsel %vm561_vm1, %v484_v50, %v617_v58  ;;  %vm562_vm4 = vcmp.ge.f32.partialorder %v487_v59, 0.0  ;;  %v618_v63 = vmul.f32 %v1142_v30, %v487_v59 }
 0x11c   :  { %v641_v0 = vsel %vm536_vm3, %v383_v55, %v592_v61  ;;  %716 = vst.msk [vmem:[%s1442_s4 + $0x140] sm:$0xff] %vm675_vm2, %v666_v62 }
 0x11d   :  { %691 = vst.msk [vmem:[%s1442_s4 + $0x78] sm:$0xff] %vm675_vm2, %v641_v0  ;;  %v387_v1 = vpop.f32.mrb[32].mxu0  ;;  %v667_v2 = vsel %vm562_vm4, %v487_v59, %v618_v63  ;;  %v491_v3 = vpop.f32.mrb[32].mxu1 }
 0x11e   :  { %v388_v4 = vadd.f32 %v1137_v28, %v387_v1  ;;  %717 = vst.msk [vmem:[%s1442_s4 + $0x148] sm:$0xff] %vm675_vm2, %v667_v2  ;;  %v848_v5 = vpop.f32.mrb[33].mxu0  ;;  %v492_v6 = vadd.f32 %v1137_v28, %v491_v3  ;;  %v900_v7 = vpop.f32.mrb[33].mxu1 }
 0x11f   :  { %v390_v8 = vpop.f32.mrb[34].mxu0  ;;  %v494_v9 = vpop.f32.mrb[34].mxu1 }
 0x120   :  { %vm537_vm5 = vcmp.ge.f32.partialorder %v388_v4, 0.0  ;;  %v593_v10 = vmul.f32 %v1142_v30, %v388_v4  ;;  %v391_v11 = vadd.f32 %v1137_v28, %v390_v8  ;;  %v849_v12 = vpop.f32.mrb[35].mxu0  ;;  %vm563_vm6 = vcmp.ge.f32.partialorder %v492_v6, 0.0  ;;  %v901_v13 = vpop.f32.mrb[35].mxu1 }
 0x121   :  { %v619_v14 = vmul.f32 %v1142_v30, %v492_v6  ;;  %v495_v15 = vadd.f32 %v1137_v28, %v494_v9 }
 0x122   :  { %v642_v16 = vsel %vm537_vm5, %v388_v4, %v593_v10  ;;  %vm538_vm7 = vcmp.ge.f32.partialorder %v391_v11, 0.0  ;;  %v594_v17 = vmul.f32 %v1142_v30, %v391_v11 }
 0x123   :  { %692 = vst.msk [vmem:[%s1442_s4 + $0x80] sm:$0xff] %vm675_vm2, %v642_v16  ;;  %v668_v18 = vsel %vm563_vm6, %v492_v6, %v619_v14  ;;  %vm564_vm8 = vcmp.ge.f32.partialorder %v495_v15, 0.0  ;;  %v620_v19 = vmul.f32 %v1142_v30, %v495_v15 }
 0x124   :  { %v643_v20 = vsel %vm538_vm7, %v391_v11, %v594_v17  ;;  %718 = vst.msk [vmem:[%s1442_s4 + $0x150] sm:$0xff] %vm675_vm2, %v668_v18 }
 0x125   :  { %693 = vst.msk [vmem:[%s1442_s4 + $0x88] sm:$0xff] %vm675_vm2, %v643_v20  ;;  %v395_v21 = vpop.f32.mrb[36].mxu0  ;;  %v669_v22 = vsel %vm564_vm8, %v495_v15, %v620_v19  ;;  %v499_v23 = vpop.f32.mrb[36].mxu1 }
 0x126   :  { %v396_v24 = vadd.f32 %v1137_v28, %v395_v21  ;;  %719 = vst.msk [vmem:[%s1442_s4 + $0x158] sm:$0xff] %vm675_vm2, %v669_v22  ;;  %v852_v25 = vpop.f32.mrb[37].mxu0  ;;  %v500_v26 = vadd.f32 %v1137_v28, %v499_v23  ;;  %v904_v27 = vpop.f32.mrb[37].mxu1 }
 0x127   :  { %v398_v29 = vpop.f32.mrb[38].mxu0  ;;  %v502_v31 = vpop.f32.mrb[38].mxu1 }
 0x128   :  { %vm539_vm9 = vcmp.ge.f32.partialorder %v396_v24, 0.0  ;;  %v595_v32 = vmul.f32 %v1142_v30, %v396_v24  ;;  %v399_v33 = vadd.f32 %v1137_v28, %v398_v29  ;;  %v853_v34 = vpop.f32.mrb[39].mxu0  ;;  %vm565_vm10 = vcmp.ge.f32.partialorder %v500_v26, 0.0  ;;  %v905_v35 = vpop.f32.mrb[39].mxu1 }
 0x129   :  { %v621_v36 = vmul.f32 %v1142_v30, %v500_v26  ;;  %v503_v37 = vadd.f32 %v1137_v28, %v502_v31 }
 0x12a   :  { %v644_v38 = vsel %vm539_vm9, %v396_v24, %v595_v32  ;;  %vm540_vm11 = vcmp.ge.f32.partialorder %v399_v33, 0.0  ;;  %v596_v39 = vmul.f32 %v1142_v30, %v399_v33 }
 0x12b   :  { %694 = vst.msk [vmem:[%s1442_s4 + $0x90] sm:$0xff] %vm675_vm2, %v644_v38  ;;  %v670_v40 = vsel %vm565_vm10, %v500_v26, %v621_v36  ;;  %vm566_vm12 = vcmp.ge.f32.partialorder %v503_v37, 0.0  ;;  %v622_v41 = vmul.f32 %v1142_v30, %v503_v37 }
 0x12c   :  { %v645_v42 = vsel %vm540_vm11, %v399_v33, %v596_v39  ;;  %720 = vst.msk [vmem:[%s1442_s4 + $0x160] sm:$0xff] %vm675_vm2, %v670_v40 }
 0x12d   :  { %695 = vst.msk [vmem:[%s1442_s4 + $0x98] sm:$0xff] %vm675_vm2, %v645_v42  ;;  %v403_v43 = vpop.f32.mrb[40].mxu0  ;;  %v671_v44 = vsel %vm566_vm12, %v503_v37, %v622_v41  ;;  %v507_v45 = vpop.f32.mrb[40].mxu1 }
 0x12e   :  { %v404_v46 = vadd.f32 %v1137_v28, %v403_v43  ;;  %721 = vst.msk [vmem:[%s1442_s4 + $0x168] sm:$0xff] %vm675_vm2, %v671_v44  ;;  %v856_v47 = vpop.f32.mrb[41].mxu0  ;;  %v508_v48 = vadd.f32 %v1137_v28, %v507_v45  ;;  %v908_v49 = vpop.f32.mrb[41].mxu1 }
 0x12f   :  { %v406_v50 = vpop.f32.mrb[42].mxu0  ;;  %v510_v51 = vpop.f32.mrb[42].mxu1 }
 0x130   :  { %vm541_vm13 = vcmp.ge.f32.partialorder %v404_v46, 0.0  ;;  %v597_v52 = vmul.f32 %v1142_v30, %v404_v46  ;;  %v407_v53 = vadd.f32 %v1137_v28, %v406_v50  ;;  %v857_v54 = vpop.f32.mrb[43].mxu0  ;;  %vm567_vm14 = vcmp.ge.f32.partialorder %v508_v48, 0.0  ;;  %v909_v55 = vpop.f32.mrb[43].mxu1 }
 0x131   :  { %v623_v56 = vmul.f32 %v1142_v30, %v508_v48  ;;  %v511_v57 = vadd.f32 %v1137_v28, %v510_v51 }
 0x132   :  { %v646_v58 = vsel %vm541_vm13, %v404_v46, %v597_v52  ;;  %vm542_vm15 = vcmp.ge.f32.partialorder %v407_v53, 0.0  ;;  %v598_v59 = vmul.f32 %v1142_v30, %v407_v53 }
 0x133   :  { %696 = vst.msk [vmem:[%s1442_s4 + $0xa0] sm:$0xff] %vm675_vm2, %v646_v58  ;;  %v672_v60 = vsel %vm567_vm14, %v508_v48, %v623_v56  ;;  %vm568_vm0 = vcmp.ge.f32.partialorder %v511_v57, 0.0  ;;  %v624_v61 = vmul.f32 %v1142_v30, %v511_v57 }
 0x134   :  { %v647_v62 = vsel %vm542_vm15, %v407_v53, %v598_v59  ;;  %722 = vst.msk [vmem:[%s1442_s4 + $0x170] sm:$0xff] %vm675_vm2, %v672_v60 }
 0x135   :  { %697 = vst.msk [vmem:[%s1442_s4 + $0xa8] sm:$0xff] %vm675_vm2, %v647_v62  ;;  %v411_v63 = vpop.f32.mrb[44].mxu0  ;;  %v673_v0 = vsel %vm568_vm0, %v511_v57, %v624_v61  ;;  %v515_v1 = vpop.f32.mrb[44].mxu1 }
 0x136   :  { %v412_v2 = vadd.f32 %v1137_v28, %v411_v63  ;;  %723 = vst.msk [vmem:[%s1442_s4 + $0x178] sm:$0xff] %vm675_vm2, %v673_v0  ;;  %v860_v3 = vpop.f32.mrb[45].mxu0  ;;  %v516_v4 = vadd.f32 %v1137_v28, %v515_v1  ;;  %v912_v5 = vpop.f32.mrb[45].mxu1 }
 0x137   :  { %v414_v6 = vpop.f32.mrb[46].mxu0  ;;  %v518_v7 = vpop.f32.mrb[46].mxu1 }
 0x138   :  { %vm543_vm1 = vcmp.ge.f32.partialorder %v412_v2, 0.0  ;;  %v599_v8 = vmul.f32 %v1142_v30, %v412_v2  ;;  %v415_v9 = vadd.f32 %v1137_v28, %v414_v6  ;;  %v861_v10 = vpop.f32.mrb[47].mxu0  ;;  %vm569_vm3 = vcmp.ge.f32.partialorder %v516_v4, 0.0  ;;  %v913_v11 = vpop.f32.mrb[47].mxu1 }
 0x139   :  { %v625_v12 = vmul.f32 %v1142_v30, %v516_v4 }
 0x13a   :  { %v648_v13 = vsel %vm543_vm1, %v412_v2, %v599_v8  ;;  %vm544_vm4 = vcmp.ge.f32.partialorder %v415_v9, 0.0  ;;  %v600_v14 = vmul.f32 %v1142_v30, %v415_v9 }
 0x13b   :  { %698 = vst.msk [vmem:[%s1442_s4 + $0xb0] sm:$0xff] %vm675_vm2, %v648_v13  ;;  %v674_v15 = vsel %vm569_vm3, %v516_v4, %v625_v12 }
 0x13c   :  { %v649_v16 = vsel %vm544_vm4, %v415_v9, %v600_v14  ;;  %724 = vst.msk [vmem:[%s1442_s4 + $0x180] sm:$0xff] %vm675_vm2, %v674_v15 }
 0x13d   :  { %699 = vst.msk [vmem:[%s1442_s4 + $0xb8] sm:$0xff] %vm675_vm2, %v649_v16  ;;  %v419_v17 = vpop.f32.mrb[48].mxu0 }
 0x13e   :  { %v420_v18 = vadd.f32 %v1137_v28, %v419_v17  ;;  %v864_v19 = vpop.f32.mrb[49].mxu0 }
 0x13f   :  { %v422_v20 = vpop.f32.mrb[50].mxu0 }
 0x140   :  { %vm545_vm5 = vcmp.ge.f32.partialorder %v420_v18, 0.0  ;;  %v601_v21 = vmul.f32 %v1142_v30, %v420_v18  ;;  %v423_v22 = vadd.f32 %v1137_v28, %v422_v20  ;;  %v865_v23 = vpop.f32.mrb[51].mxu0 }
 0x142   :  { %v650_v24 = vsel %vm545_vm5, %v420_v18, %v601_v21  ;;  %vm546_vm6 = vcmp.ge.f32.partialorder %v423_v22, 0.0  ;;  %v602_v25 = vmul.f32 %v1142_v30, %v423_v22 }
 0x143   :  { %700 = vst.msk [vmem:[%s1442_s4 + $0xc0] sm:$0xff] %vm675_vm2, %v650_v24 }
 0x144   :  { %v651_v26 = vsel %vm546_vm6, %v423_v22, %v602_v25 }
 0x145   :  { %701 = vst.msk [vmem:[%s1442_s4 + $0xc8] sm:$0xff] %vm675_vm2, %v651_v26 }

// kernel: pnet_forward.6
= control target key start
LH: loop header
LB: loop body
LE: loop exit
PB: predicated region body
PF: predicated region fallthrough
CT: control target
= control target key end

     0   :  { %vm108_vm0 = vcmask 130048   ;;  %s359_s0 = inlined_call_operand.vmem [shape: f32[104,16], index: 0, kind: input, shape index: {}]   ;;  %s360_s1 = inlined_call_operand.vmem [shape: f32[104,16], index: 1, kind: input, shape index: {}]   ;;  %s361_s2 = inlined_call_operand.vmem [shape: f32[104,16], index: 2, kind: input, shape index: {}]   ;;  %s362_s3 = inlined_call_operand.vmem [shape: f32[104,16], index: 3, kind: input, shape index: {}]   ;;  %s363_s4 = inlined_call_operand.vmem [shape: f32[104,16], index: 4, kind: output, shape index: {}]  }
   0x1   :  { %v17_v0 = vld [vmem:[%s359_s0] sm:$0xff]  ;;  %v18_v5 = vld [vmem:[%s359_s0 + $0x8] sm:$0xff]  ;;  %v19_v11 = vld [vmem:[%s359_s0 + $0x10] sm:$0xff] }
   0x2   :  { %v30_v1 = vld [vmem:[%s360_s1] sm:$0xff]  ;;  %v31_v6 = vld [vmem:[%s360_s1 + $0x8] sm:$0xff]  ;;  %v32_v13 = vld [vmem:[%s360_s1 + $0x10] sm:$0xff] }
   0x3   :  { %v56_v2 = vld [vmem:[%s361_s2] sm:$0xff]  ;;  %v43_v3 = vmax.f32 %v17_v0, %v30_v1  ;;  %v44_v8 = vmax.f32 %v18_v5, %v31_v6  ;;  %v57_v9 = vld [vmem:[%s361_s2 + $0x8] sm:$0xff]  ;;  %v58_v14 = vld [vmem:[%s361_s2 + $0x10] sm:$0xff]  ;;  %v45_v17 = vmax.f32 %v19_v11, %v32_v13 }
   0x4   :  { %v69_v4 = vld [vmem:[%s362_s3] sm:$0xff]  ;;  %v70_v10 = vld [vmem:[%s362_s3 + $0x8] sm:$0xff]  ;;  %v71_v15 = vld [vmem:[%s362_s3 + $0x10] sm:$0xff] }
   0x5   :  { %v82_v7 = vmax.f32 %v56_v2, %v69_v4  ;;  %v83_v12 = vmax.f32 %v57_v9, %v70_v10  ;;  %v84_v18 = vmax.f32 %v58_v14, %v71_v15  ;;  %v20_v19 = vld [vmem:[%s359_s0 + $0x18] sm:$0xff]  ;;  %v21_v25 = vld [vmem:[%s359_s0 + $0x20] sm:$0xff]  ;;  %v22_v32 = vld [vmem:[%s359_s0 + $0x28] sm:$0xff] }
   0x6   :  { %v33_v20 = vld [vmem:[%s360_s1 + $0x18] sm:$0xff]  ;;  %v34_v26 = vld [vmem:[%s360_s1 + $0x20] sm:$0xff]  ;;  %v35_v34 = vld [vmem:[%s360_s1 + $0x28] sm:$0xff] }
   0x7   :  { %v95_v16 = vmax.f32 %v43_v3, %v82_v7  ;;  %v59_v21 = vld [vmem:[%s361_s2 + $0x18] sm:$0xff]  ;;  %v96_v22 = vmax.f32 %v44_v8, %v83_v12  ;;  %v46_v23 = vmax.f32 %v20_v19, %v33_v20  ;;  %v97_v27 = vmax.f32 %v45_v17, %v84_v18  ;;  %v60_v30 = vld [vmem:[%s361_s2 + $0x20] sm:$0xff]  ;;  %v61_v35 = vld [vmem:[%s361_s2 + $0x28] sm:$0xff] }
   0x8   :  { %v72_v24 = vld [vmem:[%s362_s3 + $0x18] sm:$0xff]  ;;  %v47_v29 = vmax.f32 %v21_v25, %v34_v26  ;;  %v73_v31 = vld [vmem:[%s362_s3 + $0x20] sm:$0xff]  ;;  %v74_v36 = vld [vmem:[%s362_s3 + $0x28] sm:$0xff]  ;;  %v48_v38 = vmax.f32 %v22_v32, %v35_v34 }
   0x9   :  { %109 = vst.msk [vmem:[%s363_s4] sm:$0xff] %vm108_vm0, %v95_v16  ;;  %v85_v28 = vmax.f32 %v59_v21, %v72_v24  ;;  %110 = vst.msk [vmem:[%s363_s4 + $0x8] sm:$0xff] %vm108_vm0, %v96_v22  ;;  %v86_v33 = vmax.f32 %v60_v30, %v73_v31  ;;  %v87_v39 = vmax.f32 %v61_v35, %v74_v36  ;;  %v23_v40 = vld [vmem:[%s359_s0 + $0x30] sm:$0xff]  ;;  %v24_v46 = vld [vmem:[%s359_s0 + $0x38] sm:$0xff] }
   0xa   :  { %111 = vst.msk [vmem:[%s363_s4 + $0x10] sm:$0xff] %vm108_vm0, %v97_v27  ;;  %v36_v41 = vld [vmem:[%s360_s1 + $0x30] sm:$0xff]  ;;  %v37_v47 = vld [vmem:[%s360_s1 + $0x38] sm:$0xff]  ;;  %v25_v53 = vld [vmem:[%s359_s0 + $0x40] sm:$0xff] }
   0xb   :  { %v98_v37 = vmax.f32 %v46_v23, %v85_v28  ;;  %v62_v42 = vld [vmem:[%s361_s2 + $0x30] sm:$0xff]  ;;  %v99_v43 = vmax.f32 %v47_v29, %v86_v33  ;;  %v49_v44 = vmax.f32 %v23_v40, %v36_v41  ;;  %v100_v48 = vmax.f32 %v48_v38, %v87_v39  ;;  %v63_v51 = vld [vmem:[%s361_s2 + $0x38] sm:$0xff]  ;;  %v38_v55 = vld [vmem:[%s360_s1 + $0x40] sm:$0xff] }
   0xc   :  { %v75_v45 = vld [vmem:[%s362_s3 + $0x30] sm:$0xff]  ;;  %v50_v50 = vmax.f32 %v24_v46, %v37_v47  ;;  %v76_v52 = vld [vmem:[%s362_s3 + $0x38] sm:$0xff]  ;;  %v64_v56 = vld [vmem:[%s361_s2 + $0x40] sm:$0xff]  ;;  %v51_v59 = vmax.f32 %v25_v53, %v38_v55 }
   0xd   :  { %112 = vst.msk [vmem:[%s363_s4 + $0x18] sm:$0xff] %vm108_vm0, %v98_v37  ;;  %v88_v49 = vmax.f32 %v62_v42, %v75_v45  ;;  %113 = vst.msk [vmem:[%s363_s4 + $0x20] sm:$0xff] %vm108_vm0, %v99_v43  ;;  %v89_v54 = vmax.f32 %v63_v51, %v76_v52  ;;  %v77_v57 = vld [vmem:[%s362_s3 + $0x40] sm:$0xff]  ;;  %v26_v61 = vld [vmem:[%s359_s0 + $0x48] sm:$0xff] }
   0xe   :  { %114 = vst.msk [vmem:[%s363_s4 + $0x28] sm:$0xff] %vm108_vm0, %v100_v48  ;;  %v90_v60 = vmax.f32 %v64_v56, %v77_v57  ;;  %v39_v62 = vld [vmem:[%s360_s1 + $0x48] sm:$0xff]  ;;  %v27_v3 = vld [vmem:[%s359_s0 + $0x50] sm:$0xff]  ;;  %v28_v10 = vld [vmem:[%s359_s0 + $0x58] sm:$0xff] }
   0xf   :  { %v101_v58 = vmax.f32 %v49_v44, %v88_v49  ;;  %v65_v63 = vld [vmem:[%s361_s2 + $0x48] sm:$0xff]  ;;  %v102_v0 = vmax.f32 %v50_v50, %v89_v54  ;;  %v52_v1 = vmax.f32 %v26_v61, %v39_v62  ;;  %v40_v4 = vld [vmem:[%s360_s1 + $0x50] sm:$0xff]  ;;  %v41_v12 = vld [vmem:[%s360_s1 + $0x58] sm:$0xff] }
  0x10   :  { %v78_v2 = vld [vmem:[%s362_s3 + $0x48] sm:$0xff]  ;;  %v103_v5 = vmax.f32 %v51_v59, %v90_v60  ;;  %v53_v7 = vmax.f32 %v27_v3, %v40_v4  ;;  %v66_v8 = vld [vmem:[%s361_s2 + $0x50] sm:$0xff]  ;;  %v67_v13 = vld [vmem:[%s361_s2 + $0x58] sm:$0xff]  ;;  %v54_v16 = vmax.f32 %v28_v10, %v41_v12 }
  0x11   :  { %115 = vst.msk [vmem:[%s363_s4 + $0x30] sm:$0xff] %vm108_vm0, %v101_v58  ;;  %v91_v6 = vmax.f32 %v65_v63, %v78_v2  ;;  %v79_v9 = vld [vmem:[%s362_s3 + $0x50] sm:$0xff]  ;;  %116 = vst.msk [vmem:[%s363_s4 + $0x38] sm:$0xff] %vm108_vm0, %v102_v0  ;;  %v80_v14 = vld [vmem:[%s362_s3 + $0x58] sm:$0xff] }
  0x12   :  { %v92_v11 = vmax.f32 %v66_v8, %v79_v9  ;;  %117 = vst.msk [vmem:[%s363_s4 + $0x40] sm:$0xff] %vm108_vm0, %v103_v5  ;;  %v93_v17 = vmax.f32 %v67_v13, %v80_v14  ;;  %v29_v18 = vld [vmem:[%s359_s0 + $0x60] sm:$0xff] }
  0x13   :  { %v104_v15 = vmax.f32 %v52_v1, %v91_v6  ;;  %v42_v19 = vld [vmem:[%s360_s1 + $0x60] sm:$0xff] }
  0x14   :  { %v68_v20 = vld [vmem:[%s361_s2 + $0x60] sm:$0xff]  ;;  %v105_v21 = vmax.f32 %v53_v7, %v92_v11  ;;  %v55_v22 = vmax.f32 %v29_v18, %v42_v19  ;;  %v106_v24 = vmax.f32 %v54_v16, %v93_v17 }
  0x15   :  { %v81_v23 = vld [vmem:[%s362_s3 + $0x60] sm:$0xff]  ;;  %118 = vst.msk [vmem:[%s363_s4 + $0x48] sm:$0xff] %vm108_vm0, %v104_v15 }
  0x16   :  { %v94_v25 = vmax.f32 %v68_v20, %v81_v23  ;;  %119 = vst.msk [vmem:[%s363_s4 + $0x50] sm:$0xff] %vm108_vm0, %v105_v21  ;;  %120 = vst.msk [vmem:[%s363_s4 + $0x58] sm:$0xff] %vm108_vm0, %v106_v24 }
  0x18   :  { %v107_v26 = vmax.f32 %v55_v22, %v94_v25 }
  0x1a   :  { %121 = vst.msk [vmem:[%s363_s4 + $0x60] sm:$0xff] %vm108_vm0, %v107_v26 }

// kernel: pnet_forward.7
= control target key start
LH: loop header
LB: loop body
LE: loop exit
PB: predicated region body
PF: predicated region fallthrough
CT: control target
= control target key end

     0   :  { %v315_v0 = vmov 0   ;;  %vm137_vm0 = vcmask 130048   ;;  %s427_s1 = inlined_call_operand.vmem [shape: bf16[144,16], index: 1, kind: input, shape index: {}]   ;;  %s428_s0 = inlined_call_operand.vmem [shape: bf16[56,144], index: 0, kind: input, shape index: {}]   ;;  %s429_s2 = inlined_call_operand.vmem [shape: f32[1,16], index: 2, kind: input, shape index: {}]   ;;  %s430_s3 = inlined_call_operand.vmem [shape: f32[1,16], index: 3, kind: input, shape index: {}]   ;;  %s431_s4 = inlined_call_operand.vmem [shape: f32[56,16], index: 4, kind: output, shape index: {}]  }
   0x1   :  { %150 = vmatprep.subr.bf16.mxu0 %v315_v0  ;;  %276 = vmatprep.subr.bf16.mxu1 %v315_v0  ;;  %v295_v1 = vld [vmem:[%s427_s1] sm:$0xff]   ;;  %v296_v2 = vld [vmem:[%s427_s1 + $0x8] sm:$0xff]   ;;  %v297_v3 = vld [vmem:[%s427_s1 + $0x10] sm:$0xff]  }
   0x2   :  { %151 = vmatpush1.bf16.msra.mxu0 %v295_v1  ;;  %285 = vmatpush1.bf16.msra.mxu1 %v295_v1  ;;  %v298_v4 = vld [vmem:[%s427_s1 + $0x18] sm:$0xff]   ;;  %v306_v5 = vld [vmem:[%s428_s0 + $0x4] ss:$8 sps:$4 sm:$0xff]   ;;  %v301_v9 = vld [vmem:[%s427_s1 + $0x30] sm:$0xff]  }
   0x3   :  { %152 = vmatprep.subr.bf16.mxu0 %v315_v0  ;;  %277 = vmatprep.subr.bf16.mxu1 %v315_v0  ;;  %v309_v6 = vld [vmem:[%s428_s0 + $0x24] ss:$8 sps:$4 sm:$0xff]   ;;  %v302_v10 = vld [vmem:[%s427_s1 + $0x38] sm:$0xff]   ;;  %v24_v12 = vld [vmem:[%s428_s0 + $0x30] sm:$0xff] }
   0x4   :  { %271 = vmatprep.mubr.msk.bf16.mxu0 %vm137_vm0, %v306_v5  ;;  %273 = vmatprep.mubr.msk.bf16.mxu1 %vm137_vm0, %v309_v6  ;;  %v299_v7 = vld [vmem:[%s427_s1 + $0x20] sm:$0xff]   ;;  %v300_v8 = vld [vmem:[%s427_s1 + $0x28] sm:$0xff]   ;;  %v310_v15 = vld [vmem:[%s428_s0 + $0x14] ss:$8 sps:$4 sm:$0xff]   ;;  %v261_v16 = vcombine.high %v24_v12, %v24_v12  ;;  %v260_v18 = vcombine.low %v24_v12, %v24_v12 }
   0x5   :  { %v303_v11 = vld [vmem:[%s427_s1 + $0x40] sm:$0xff]   ;;  %v313_v17 = vld [vmem:[%s428_s0 + $0x10] ss:$8 sps:$4 sm:$0xff]  }
   0x6   :  { %153 = vmatpush1.bf16.msra.mxu0 %v296_v2  ;;  %286 = vmatpush1.bf16.msra.mxu1 %v296_v2  ;;  %v304_v13 = vld [vmem:[%s428_s0] ss:$8 sps:$4 sm:$0xff]  }
   0x7   :  { %154 = vmatprep.subr.bf16.mxu0 %v315_v0  ;;  %278 = vmatprep.subr.bf16.mxu1 %v315_v0  ;;  %v307_v14 = vld [vmem:[%s428_s0 + $0x20] ss:$8 sps:$4 sm:$0xff]  }
   0x8   :  { %v253_v19 = vld [vmem:[%s429_s2] ss:$0 sm:$0xff] }
   0x9   :  { %v275_v21 = vld [vmem:[%s430_s3] ss:$0 sm:$0xff] }
   0xa   :  { %155 = vmatpush1.bf16.msra.mxu0 %v297_v3  ;;  %287 = vmatpush1.bf16.msra.mxu1 %v297_v3 }
   0xb   :  { %156 = vmatprep.subr.bf16.mxu0 %v315_v0  ;;  %279 = vmatprep.subr.bf16.mxu1 %v315_v0 }
   0xe   :  { %157 = vmatpush1.bf16.msra.mxu0 %v298_v4  ;;  %288 = vmatpush1.bf16.msra.mxu1 %v298_v4 }
   0xf   :  { %158 = vmatprep.subr.bf16.mxu0 %v315_v0  ;;  %280 = vmatprep.subr.bf16.mxu1 %v315_v0 }
  0x12   :  { %159 = vmatpush1.bf16.msra.mxu0 %v299_v7  ;;  %289 = vmatpush1.bf16.msra.mxu1 %v299_v7 }
  0x13   :  { %160 = vmatprep.subr.bf16.mxu0 %v315_v0  ;;  %281 = vmatprep.subr.bf16.mxu1 %v315_v0 }
  0x16   :  { %161 = vmatpush1.bf16.msra.mxu0 %v300_v8  ;;  %290 = vmatpush1.bf16.msra.mxu1 %v300_v8 }
  0x17   :  { %162 = vmatprep.subr.bf16.mxu0 %v315_v0  ;;  %282 = vmatprep.subr.bf16.mxu1 %v315_v0 }
  0x1a   :  { %163 = vmatpush1.bf16.msra.mxu0 %v301_v9  ;;  %291 = vmatpush1.bf16.msra.mxu1 %v301_v9 }
  0x1b   :  { %164 = vmatprep.subr.bf16.mxu0 %v315_v0  ;;  %283 = vmatprep.subr.bf16.mxu1 %v315_v0 }
  0x1e   :  { %165 = vmatpush1.bf16.msra.mxu0 %v302_v10  ;;  %292 = vmatpush1.bf16.msra.mxu1 %v302_v10 }
  0x1f   :  { %166 = vmatprep.subr.bf16.mxu0 %v315_v0  ;;  %284 = vmatprep.subr.bf16.mxu1 %v315_v0 }
  0x22   :  { %167 = vmatpush1.bf16.msra.mxu0 %v303_v11  ;;  %293 = vmatpush1.bf16.msra.mxu1 %v303_v11 }
  0x25   :  { %183 = vmatmul.mubr.bf16.vlgmr.msra.gmra.mrb[0].mxu0 %v304_v13  ;;  %199 = vmatmul.mubr.bf16.vlgmr.msra.gmra.mrb[0].mxu1 %v307_v14 }
  0x26   :  { %272 = vmatprep.mubr.msk.bf16.mxu0 %vm137_vm0, %v310_v15  ;;  %274 = vmatprep.mubr.msk.bf16.mxu1 %vm137_vm0, %v261_v16 }
  0x2d   :  { %191 = vmatmul.mubr.bf16.gmra.mrb[4].mxu0 %v313_v17  ;;  %207 = vmatmul.mubr.bf16.gmra.mrb[4].mxu1 %v260_v18 }
  0xf8   :  { %v184_v20 = vpop.f32.mrb[0].mxu0  ;;  %v200_v22 = vpop.f32.mrb[0].mxu1 }
  0xf9   :  { %v185_v23 = vadd.f32 %v253_v19, %v184_v20  ;;  %v201_v24 = vadd.f32 %v253_v19, %v200_v22  ;;  %v186_v25 = vpop.f32.mrb[1].mxu0  ;;  %v202_v26 = vpop.f32.mrb[1].mxu1 }
  0xfa   :  { %v187_v27 = vpop.f32.mrb[2].mxu0  ;;  %v203_v28 = vpop.f32.mrb[2].mxu1 }
  0xfb   :  { %vm214_vm1 = vcmp.ge.f32.partialorder %v185_v23, 0.0  ;;  %v228_v29 = vmul.f32 %v275_v21, %v185_v23  ;;  %vm218_vm2 = vcmp.ge.f32.partialorder %v201_v24, 0.0  ;;  %v232_v30 = vmul.f32 %v275_v21, %v201_v24  ;;  %v189_v31 = vpop.f32.mrb[3].mxu0  ;;  %v205_v32 = vpop.f32.mrb[3].mxu1 }
  0xfc   :  { %v188_v33 = vadd.f32 %v253_v19, %v187_v27  ;;  %v204_v34 = vadd.f32 %v253_v19, %v203_v28 }
  0xfd   :  { %v235_v35 = vsel %vm214_vm1, %v185_v23, %v228_v29  ;;  %v239_v36 = vsel %vm218_vm2, %v201_v24, %v232_v30 }
  0xfe   :  { %242 = vst.msk [vmem:[%s431_s4] sm:$0xff] %vm137_vm0, %v235_v35  ;;  %246 = vst.msk [vmem:[%s431_s4 + $0x20] sm:$0xff] %vm137_vm0, %v239_v36  ;;  %vm215_vm3 = vcmp.ge.f32.partialorder %v188_v33, 0.0  ;;  %v229_v37 = vmul.f32 %v275_v21, %v188_v33  ;;  %vm219_vm4 = vcmp.ge.f32.partialorder %v204_v34, 0.0  ;;  %v233_v38 = vmul.f32 %v275_v21, %v204_v34 }
 0x100   :  { %v236_v39 = vsel %vm215_vm3, %v188_v33, %v229_v37  ;;  %v240_v40 = vsel %vm219_vm4, %v204_v34, %v233_v38  ;;  %v192_v41 = vpop.f32.mrb[4].mxu0  ;;  %v208_v42 = vpop.f32.mrb[4].mxu1 }
 0x101   :  { %243 = vst.msk [vmem:[%s431_s4 + $0x8] sm:$0xff] %vm137_vm0, %v236_v39  ;;  %247 = vst.msk [vmem:[%s431_s4 + $0x28] sm:$0xff] %vm137_vm0, %v240_v40  ;;  %v193_v43 = vadd.f32 %v253_v19, %v192_v41  ;;  %v209_v44 = vadd.f32 %v253_v19, %v208_v42  ;;  %v194_v45 = vpop.f32.mrb[5].mxu0  ;;  %v210_v46 = vpop.f32.mrb[5].mxu1 }
 0x102   :  { %v195_v47 = vpop.f32.mrb[6].mxu0  ;;  %v211_v48 = vpop.f32.mrb[6].mxu1 }
 0x103   :  { %vm216_vm5 = vcmp.ge.f32.partialorder %v193_v43, 0.0  ;;  %v230_v49 = vmul.f32 %v275_v21, %v193_v43  ;;  %vm220_vm6 = vcmp.ge.f32.partialorder %v209_v44, 0.0  ;;  %v234_v50 = vmul.f32 %v275_v21, %v209_v44  ;;  %v197_v51 = vpop.f32.mrb[7].mxu0  ;;  %v212_v52 = vpop.f32.mrb[7].mxu1 }
 0x104   :  { %v196_v53 = vadd.f32 %v253_v19, %v195_v47 }
 0x105   :  { %v237_v54 = vsel %vm216_vm5, %v193_v43, %v230_v49  ;;  %v241_v55 = vsel %vm220_vm6, %v209_v44, %v234_v50 }
 0x106   :  { %244 = vst.msk [vmem:[%s431_s4 + $0x10] sm:$0xff] %vm137_vm0, %v237_v54  ;;  %248 = vst.msk [vmem:[%s431_s4 + $0x30] sm:$0xff] %vm137_vm0, %v241_v55  ;;  %vm217_vm7 = vcmp.ge.f32.partialorder %v196_v53, 0.0  ;;  %v231_v56 = vmul.f32 %v275_v21, %v196_v53 }
 0x108   :  { %v238_v57 = vsel %vm217_vm7, %v196_v53, %v231_v56 }
 0x109   :  { %245 = vst.msk [vmem:[%s431_s4 + $0x18] sm:$0xff] %vm137_vm0, %v238_v57 }

// kernel: pnet_forward.9
= control target key start
LH: loop header
LB: loop body
LE: loop exit
PB: predicated region body
PF: predicated region fallthrough
CT: control target
= control target key end

     0   :  { %vm10_vm0 = vcmask 23552   ;;  %s75_s0 = inlined_call_operand.vmem [shape: f32[16,3], index: 0, kind: input, shape index: {}]   ;;  %s76_s1 = inlined_call_operand.vmem [shape: f32[16,3], index: 1, kind: output, shape index: {}]  }
   0x1   :  { %v8_v0 = vld [vmem:[%s75_s0] sm:$0xff]  ;;  %v9_v1 = vld [vmem:[%s75_s0 + $0x8] sm:$0xff] }
   0x2   :  { %v11_v2 = vsel %vm10_vm0, %v8_v0, -inf  ;;  %v14_v3 = vsel %vm10_vm0, %v9_v1, -inf }
   0x3   :  { %12 = vmax.xlane.f32.xlu0 %v11_v2 }
   0x7   :  { %15 = vmax.xlane.f32.xlu0 %v14_v3 }
  0x90   :  { %v13_v4 = vpop.xlane.xlu0 %12 }
  0x91   :  { %v17_v5 = vsub.f32 %v8_v0, %v13_v4 }
  0x93   :  { %v19_v6 = vmul.f32 1.442695, %v17_v5 }
  0x94   :  { %v16_v7 = vpop.xlane.xlu0 %15 }
  0x95   :  { %39 = vpow2.f32 %v19_v6  ;;  %v18_v8 = vsub.f32 %v9_v1, %v16_v7 }
  0x97   :  { %v21_v9 = vmul.f32 1.442695, %v18_v8 }
  0x99   :  { %41 = vpow2.f32 %v21_v9 }
  0x9f   :  { %v40_v10 = vpop.eup %39 }
  0xa0   :  { %v23_v11 = vsel %vm10_vm0, %v40_v10, 0.0 }
  0xa1   :  { %24 = vadd.xlane.f32.xlu1 %v23_v11 }
  0xa3   :  { %v42_v12 = vpop.eup %41 }
  0xa4   :  { %v26_v13 = vsel %vm10_vm0, %v42_v12, 0.0 }
  0xa5   :  { %27 = vadd.xlane.f32.xlu1 %v26_v13 }
 0x12e   :  { %v25_v14 = vpop.xlane.xlu1 %24 }
 0x12f   :  { %43 = vrcp.f32 %v25_v14 }
 0x132   :  { %v28_v15 = vpop.xlane.xlu1 %27 }
 0x133   :  { %45 = vrcp.f32 %v28_v15 }
 0x139   :  { %v44_v16 = vpop.eup %43 }
 0x13a   :  { %v30_v17 = vmul.f32 %v44_v16, %v40_v10 }
 0x13c   :  { %33 = vst.msk [vmem:[%s76_s1] sm:$0xff] %vm10_vm0, %v30_v17 }
 0x13d   :  { %v46_v18 = vpop.eup %45 }
 0x13e   :  { %v32_v19 = vmul.f32 %v46_v18, %v42_v12 }
 0x140   :  { %34 = vst.msk [vmem:[%s76_s1 + $0x8] sm:$0xff] %vm10_vm0, %v32_v19 }

// kernel: pnet_forward.8
= control target key start
LH: loop header
LB: loop body
LE: loop exit
PB: predicated region body
PF: predicated region fallthrough
CT: control target
= control target key end

     0   :  { %v331_v0 = vmov 0   ;;  %vm121_vm0 = vcmask 130048   ;;  %vm217_vm3 = vcmask 261120   ;;  %vm272_vm5 = vcmask 64512   ;;  %s429_s1 = inlined_call_operand.vmem [shape: bf16[144,32], index: 1, kind: input, shape index: {}]   ;;  %s430_s0 = inlined_call_operand.vmem [shape: bf16[24,144], index: 0, kind: input, shape index: {}]   ;;  %s431_s4 = inlined_call_operand.vmem [shape: bf16[32,8], index: 4, kind: input, shape index: {}]   ;;  %s432_s2 = inlined_call_operand.vmem [shape: f32[1,32], index: 2, kind: input, shape index: {}]   ;;  %s433_s3 = inlined_call_operand.vmem [shape: f32[1,32], index: 3, kind: input, shape index: {}]   ;;  %s434_s5 = inlined_call_operand.vmem [shape: f32[1,8], index: 5, kind: input, shape index: {}]   ;;  %s435_s6 = inlined_call_operand.vmem [shape: f32[24,8], index: 6, kind: output, shape index: {}]  }
   0x1   :  { %128 = vmatprep.subr.bf16.mxu0 %v331_v0  ;;  %v315_v1 = vld [vmem:[%s429_s1] sm:$0xff]   ;;  %v316_v2 = vld [vmem:[%s429_s1 + $0x8] sm:$0xff]   ;;  %v317_v3 = vld [vmem:[%s429_s1 + $0x10] sm:$0xff]  }
   0x2   :  { %129 = vmatpush1.bf16.msra.mxu0 %v315_v1  ;;  %v318_v4 = vld [vmem:[%s429_s1 + $0x18] sm:$0xff]   ;;  %v326_v5 = vld [vmem:[%s430_s0 + $0x4] ss:$8 sps:$4 sm:$0xff]   ;;  %v321_v8 = vld [vmem:[%s429_s1 + $0x30] sm:$0xff]  }
   0x3   :  { %130 = vmatprep.subr.bf16.mxu0 %v331_v0  ;;  %294 = vmatprep.mubr.msk.bf16.mxu0 %vm121_vm0, %v326_v5  ;;  %v319_v6 = vld [vmem:[%s429_s1 + $0x20] sm:$0xff]   ;;  %v320_v7 = vld [vmem:[%s429_s1 + $0x28] sm:$0xff]   ;;  %v322_v9 = vld [vmem:[%s429_s1 + $0x38] sm:$0xff]  }
   0x4   :  { %v323_v10 = vld [vmem:[%s429_s1 + $0x40] sm:$0xff]   ;;  %v26_v11 = vld [vmem:[%s430_s0 + $0x10] sm:$0xff]  ;;  %v330_v16 = vld [vmem:[%s431_s4 + $0x8] sm:$0xff]  }
   0x5   :  { %v324_v12 = vld [vmem:[%s430_s0] ss:$8 sps:$4 sm:$0xff]   ;;  %v284_v13 = vcombine.high %v26_v11, %v26_v11  ;;  %v283_v14 = vcombine.low %v26_v11, %v26_v11 }
   0x6   :  { %131 = vmatpush1.bf16.msra.mxu0 %v316_v2  ;;  %v329_v15 = vld [vmem:[%s431_s4] sm:$0xff]  }
   0x7   :  { %132 = vmatprep.subr.bf16.mxu0 %v331_v0  ;;  %306 = vmatprep.subr.bf16.mxu1 %v329_v15  ;;  %v280_v17 = vld [vmem:[%s432_s2] ss:$0 sm:$0xff] }
   0x8   :  { %307 = vmatpush3.bf16.msra.mxu1 %v329_v15  ;;  %v296_v19 = vld [vmem:[%s433_s3] ss:$0 sm:$0xff] }
   0x9   :  { %308 = vmatprep.subr.bf16.mxu1 %v330_v16  ;;  %v297_v38 = vld [vmem:[%s434_s5] ss:$0 sm:$0xff] }
   0xa   :  { %133 = vmatpush1.bf16.msra.mxu0 %v317_v3 }
   0xb   :  { %134 = vmatprep.subr.bf16.mxu0 %v331_v0 }
   0xc   :  { %309 = vmatpush3.bf16.msra.mxu1 %v330_v16 }
   0xe   :  { %135 = vmatpush1.bf16.msra.mxu0 %v318_v4 }
   0xf   :  { %136 = vmatprep.subr.bf16.mxu0 %v331_v0 }
  0x12   :  { %137 = vmatpush1.bf16.msra.mxu0 %v319_v6 }
  0x13   :  { %138 = vmatprep.subr.bf16.mxu0 %v331_v0 }
  0x16   :  { %139 = vmatpush1.bf16.msra.mxu0 %v320_v7 }
  0x17   :  { %140 = vmatprep.subr.bf16.mxu0 %v331_v0 }
  0x1a   :  { %141 = vmatpush1.bf16.msra.mxu0 %v321_v8 }
  0x1b   :  { %142 = vmatprep.subr.bf16.mxu0 %v331_v0 }
  0x1e   :  { %143 = vmatpush1.bf16.msra.mxu0 %v322_v9 }
  0x1f   :  { %144 = vmatprep.subr.bf16.mxu0 %v331_v0 }
  0x22   :  { %145 = vmatpush1.bf16.msra.mxu0 %v323_v10 }
  0x25   :  { %161 = vmatmul.mubr.bf16.vlgmr.msra.gmra.mrb[0].mxu0 %v324_v12 }
  0x26   :  { %295 = vmatprep.mubr.msk.bf16.mxu0 %vm121_vm0, %v284_v13 }
  0x2d   :  { %169 = vmatmul.mubr.bf16.gmra.mrb[4].mxu0 %v283_v14 }
  0xf8   :  { %v162_v18 = vpop.f32.mrb[0].mxu0 }
  0xf9   :  { %v163_v20 = vadd.f32 %v280_v17, %v162_v18  ;;  %v164_v21 = vpop.f32.mrb[1].mxu0 }
  0xfa   :  { %v165_v22 = vpop.f32.mrb[2].mxu0 }
  0xfb   :  { %v186_v23 = vmul.f32 %v296_v19, %v163_v20  ;;  %v166_v24 = vadd.f32 %v280_v17, %v165_v22  ;;  %v167_v25 = vpop.f32.mrb[3].mxu0  ;;  %vm176_vm1 = vcmp.ge.f32.partialorder %v163_v20, 0.0 }
  0xfd   :  { %v187_v26 = vmul.f32 %v296_v19, %v166_v24  ;;  %vm177_vm2 = vcmp.ge.f32.partialorder %v166_v24, 0.0  ;;  %v189_v27 = vsel %vm176_vm1, %v163_v20, %v186_v23 }
  0xff   :  { %v190_v28 = vsel %vm177_vm2, %v166_v24, %v187_v26 }
 0x100   :  { %v170_v29 = vpop.f32.mrb[4].mxu0  ;;  %v192_v30 = vpack.c.bf16 %v190_v28, %v189_v27 }
 0x101   :  { %v171_v31 = vadd.f32 %v280_v17, %v170_v29  ;;  %v172_v32 = vpop.f32.mrb[5].mxu0 }
 0x102   :  { %v173_v33 = vpop.f32.mrb[6].mxu0  ;;  %310 = vmatprep.mubr.msk.bf16.mxu1 %vm217_vm3, %v192_v30 }
 0x103   :  { %vm178_vm4 = vcmp.ge.f32.partialorder %v171_v31, 0.0  ;;  %v188_v34 = vmul.f32 %v296_v19, %v171_v31  ;;  %v174_v35 = vpop.f32.mrb[7].mxu0 }
 0x105   :  { %v191_v36 = vsel %vm178_vm4, %v171_v31, %v188_v34 }
 0x106   :  { %v193_v37 = vpack.c.bf16 %v191_v36, %v191_v36 }
 0x108   :  { %311 = vmatmul.mubr.msk.bf16.vlgmr.msra.gmra.mrb[0].mxu1 %vm217_vm3, %v193_v37 }
 0x1db   :  { %v312_v39 = vpop.f32.mrb[0].mxu1 }
 0x1dc   :  { %v267_v40 = vadd.f32 %v312_v39, %v297_v38  ;;  %v258_v41 = vpop.f32.mrb[1].mxu1 }
 0x1dd   :  { %v259_v42 = vadd.f32 %v297_v38, %v258_v41  ;;  %v313_v43 = vpop.f32.mrb[2].mxu1 }
 0x1de   :  { %275 = vst.msk [vmem:[%s435_s6 + $0x10] sm:$0xff] %vm272_vm5, %v267_v40  ;;  %v261_v44 = vpop.f32.mrb[3].mxu1 }
 0x1df   :  { %273 = vst.msk [vmem:[%s435_s6] sm:$0xff] %vm272_vm5, %v259_v42  ;;  %v262_v45 = vadd.f32 %v297_v38, %v261_v44 }
 0x1e1   :  { %274 = vst.msk [vmem:[%s435_s6 + $0x8] sm:$0xff] %vm272_vm5, %v262_v45 }

</bundles_post_ra>
